<compile_context>
chip_gen: v6e
topology: v6e:2x2x1
jax: 0.10.0
libtpu: 0.0.40
codegen_flags: <defaults>
</compile_context>

<pallas_src>
import functools

import jax
import jax.numpy as jnp
from jax.experimental import pallas as pl
from jax.experimental.pallas import tpu as pltpu

LN_EPS = 1e-5
LANE = 128          # pad every feature axis to one full vreg lane width
NEG_INF = -1e30     # bias value for padded output lanes (ignored by log_softmax)


# ---------------- fused Pallas kernel ----------------

def make_fused_kernel(n_pad, tm, hidden_valid):
    """Fused GNN forward; one grid step = one (layer, node-row-tile) pair."""
    inv_h = 1.0 / float(hidden_valid)

    def kernel(a_ref, x_ref, w_ref, b_ref, g_ref, be_ref, wmp_ref, bmp_ref,
               emb_ref, out_ref, h_ref):
        l = pl.program_id(0)          # layer index (0 = conv1)
        i = pl.program_id(1)          # node row-tile index

        # Seed the ping-pong activation scratch with X once (slot 0 = layer-0 input).
        @pl.when(jnp.logical_and(l == 0, i == 0))
        def _():
            h_ref[pl.ds(0, n_pad), :] = x_ref[...]

        prev = jax.lax.rem(l, 2)
        nxt = 1 - prev
        prev0 = pl.multiple_of(prev * n_pad, tm)
        next0 = pl.multiple_of(nxt * n_pad + i * tm, tm)

        h_prev = h_ref[pl.ds(prev0, n_pad), :]                    # (n_pad, 128) bf16

        # GCNConv on this row tile: (A_tile @ H) @ W + b  ==  A_tile @ (H W) + b
        ah = jnp.dot(a_ref[...], h_prev, preferred_element_type=jnp.float32)
        pre = jnp.dot(ah.astype(jnp.bfloat16), w_ref[l],
                      preferred_element_type=jnp.float32) + b_ref[pl.ds(l, 1), :]

        # ReLU + LayerNorm over the valid hidden lanes (mean AND variance masked).
        lane_idx = jax.lax.broadcasted_iota(jnp.int32, (1, LANE), 1)
        feat_mask = (lane_idx < hidden_valid).astype(jnp.float32)
        y = jnp.maximum(pre, 0.0)
        mean = jnp.sum(y * feat_mask, axis=-1, keepdims=True) * inv_h
        diff = y - mean
        var = jnp.sum(diff * diff * feat_mask, axis=-1, keepdims=True) * inv_h
        # gamma/beta are zero-padded -> padded lanes return to exactly 0.
        h = (diff * jax.lax.rsqrt(var + LN_EPS)) * g_ref[pl.ds(l, 1), :] \
            + be_ref[pl.ds(l, 1), :]
        # Dropout: eval-mode identity.  TODO(synk): training-mode dropout.

        h_bf = h.astype(jnp.bfloat16)
        h_ref[pl.ds(next0, tm), :] = h_bf                          # next layer's input

        # Write this layer's results every layer; the sequential outermost layer
        # axis guarantees the LAST layer's writes are the ones that land last in
        # HBM, so the outputs equal emb / log_softmax of the final layer.
        emb_ref[...] = pre

        # collapsed post-MLP (one matmul) + log_softmax over the valid lanes
        # (padded lanes of bmp carry NEG_INF -> never affect max / sum-exp).
        logits = jnp.dot(h_bf, wmp_ref[...],
                         preferred_element_type=jnp.float32) + bmp_ref[...]
        m = jnp.max(logits, axis=-1, keepdims=True)
        z = logits - m
        lse = jnp.log(jnp.sum(jnp.exp(z), axis=-1, keepdims=True))
        out_ref[...] = z - lse

    return kernel


# ---------------- wrappers / packing (plain JAX glue) ----------------

def _default_tm():
    """TM=256 fills the v6e/v7x 2x256^2 MXU M-width; 128 saturates v5e's 4x128^2."""
    try:
        kind = jax.devices()[0].device_kind.lower()
    except Exception:
        return 128
    return 256 if ("v6" in kind or "v7" in kind) else 128


def _vmem_limit_bytes(n_pad, tm, n_stack):
    """Explicit scoped-VMEM budget: blocks x2 (double buffering) + scratch + margin."""
    a_blk = tm * n_pad * 2                       # bf16 A_hat row block
    x_full = n_pad * LANE * 2                    # bf16 X (resident)
    w_stack = n_stack * LANE * LANE * 2          # bf16 conv weights
    vecs = 3 * n_stack * LANE * 4 + LANE * LANE * 2 + LANE * 4
    out_blk = 2 * tm * LANE * 4                  # emb + log_softmax blocks (f32)
    h_scratch = 2 * n_pad * LANE * 2             # bf16 ping-pong activations
    need = 2 * (a_blk + x_full + w_stack + vecs + out_blk) + h_scratch
    # floor 32 MiB for compiler headroom, cap at v7x physical 64 MiB per core.
    return int(min(max(2 * need, 32 << 20), 64 << 20))


def _pad_lanes(x, target, axis=-1, value=0.0):
    pad = target - x.shape[axis]
    if pad <= 0:
        return x
    widths = [(0, 0)] * x.ndim
    widths[axis] = (0, pad)
    return jnp.pad(x, widths, constant_values=value)


def build_norm_adj(edge_index, num_nodes, n_pad):
    """Dense D^-1/2 (A + I) D^-1/2, zero-padded to (n_pad, n_pad), bf16."""
    src, dst = edge_index[0], edge_index[1]
    a = jnp.zeros((num_nodes, num_nodes), jnp.float32).at[dst, src].set(1.0)
    # add_remaining_self_loops semantics: diagonal is 1 whether or not present
    a = jnp.maximum(a, jnp.eye(num_nodes, dtype=jnp.float32))
    deg = jnp.sum(a, axis=1)
    dinv = jnp.where(deg > 0, 1.0 / jnp.sqrt(deg), 0.0)
    a_hat = a * dinv[:, None] * dinv[None, :]
    # padded rows/cols are exactly zero -> padded nodes never reach real nodes
    a_hat = jnp.pad(a_hat, ((0, n_pad - num_nodes), (0, n_pad - num_nodes)))
    return a_hat.astype(jnp.bfloat16)


def pack_params(params):
    """Pad to 128 lanes, stack conv1 + hidden convs, collapse the post-MLP."""
    def pad_w(w):
        w = _pad_lanes(_pad_lanes(w, LANE, axis=0), LANE, axis=1)
        return w.astype(jnp.bfloat16)

    def pad_v(v, value=0.0):
        return _pad_lanes(v, LANE, axis=1, value=value).astype(jnp.float32)

    ws = [pad_w(params["conv1_w"])]
    bs = [pad_v(params["conv1_b"])]
    gs = [pad_v(params["ln1_g"])]
    bes = [pad_v(params["ln1_b"])]
    for (w, b, g, be) in params["layers"]:
        ws.append(pad_w(w)); bs.append(pad_v(b)); gs.append(pad_v(g)); bes.append(pad_v(be))

    packed = {
        "w": jnp.stack(ws),                       # (L+1, 128, 128) bf16
        "b": jnp.concatenate(bs, axis=0),         # (L+1, 128) f32
        "g": jnp.concatenate(gs, axis=0),         # (L+1, 128) f32
        "be": jnp.concatenate(bes, axis=0),       # (L+1, 128) f32
    }

    # post_mp = Linear->Linear->Linear with no nonlinearity: collapse exactly.
    #   logits = x @ (W1 W2 W3) + (b1 W2 W3 + b2 W3 + b3)
    w1, b1 = params["mp_w1"], params["mp_b1"]
    w2, b2 = params["mp_w2"], params["mp_b2"]
    w3, b3 = params["mp_w3"], params["mp_b3"]
    w = w1 @ w2 @ w3
    b = b1 @ w2 @ w3 + b2 @ w3 + b3
    packed["mp_w"] = pad_w(w)
    packed["mp_b"] = pad_v(b, value=NEG_INF)      # padded logits -> -inf before softmax
    return packed


def gnn_forward_fused(packed, a_hat, x_padded, *, num_layers, hidden_dim,
                      output_dim, num_nodes, tm):
    n_pad = x_padded.shape[0]
    n_stack = num_layers + 1
    num_row_tiles = n_pad // tm
    kernel = make_fused_kernel(n_pad, tm, hidden_dim)

    emb_p, logp_p = pl.pallas_call(
        kernel,
        out_shape=(jax.ShapeDtypeStruct((n_pad, LANE), jnp.float32),   # emb (padded)
                   jax.ShapeDtypeStruct((n_pad, LANE), jnp.float32)),  # log_softmax (padded)
        grid=(n_stack, num_row_tiles),
        in_specs=[
            pl.BlockSpec((tm, n_pad), lambda l, i: (i, 0)),               # A_hat row block
            pl.BlockSpec((n_pad, LANE), lambda l, i: (0, 0)),             # X (resident)
            pl.BlockSpec((n_stack, LANE, LANE), lambda l, i: (0, 0, 0)),  # stacked conv W
            pl.BlockSpec((n_stack, LANE), lambda l, i: (0, 0)),           # stacked b
            pl.BlockSpec((n_stack, LANE), lambda l, i: (0, 0)),           # stacked gamma
            pl.BlockSpec((n_stack, LANE), lambda l, i: (0, 0)),           # stacked beta
            pl.BlockSpec((LANE, LANE), lambda l, i: (0, 0)),              # collapsed MLP W
            pl.BlockSpec((1, LANE), lambda l, i: (0, 0)),                 # collapsed MLP b
        ],
        out_specs=(pl.BlockSpec((tm, LANE), lambda l, i: (i, 0)),
                   pl.BlockSpec((tm, LANE), lambda l, i: (i, 0))),
        scratch_shapes=[pltpu.VMEM((2 * n_pad, LANE), jnp.bfloat16)],     # H ping-pong
        compiler_params=pltpu.CompilerParams(
            # Row axis must stay sequential: each layer's tiles read the FULL
            # previous-layer H from per-core scratch (see megacore note above).
            dimension_semantics=("arbitrary", "arbitrary"),
            vmem_limit_bytes=_vmem_limit_bytes(n_pad, tm, n_stack)),
    )(a_hat, x_padded, packed["w"], packed["b"], packed["g"], packed["be"],
      packed["mp_w"], packed["mp_b"])

    emb = emb_p[:num_nodes, :hidden_dim]
    logp = logp_p[:num_nodes, :output_dim]
    return emb, None, logp


# ---------------- parameter init (deterministic) ----------------

def init_params(key, input_dim, hidden_dim, dense_hidden_dim, output_dim, num_layers):
    keys = jax.random.split(key, 16)
    k = iter(keys)

    def lin(kk, fan_in, fan_out):
        w = jax.random.normal(kk, (fan_in, fan_out), jnp.float32) * 0.1
        b = jnp.zeros((1, fan_out), jnp.float32)
        return w, b

    p = {}
    p["conv1_w"], p["conv1_b"] = lin(next(k), input_dim, hidden_dim)
    p["ln1_g"] = jnp.ones((1, hidden_dim), jnp.float32)
    p["ln1_b"] = jnp.zeros((1, hidden_dim), jnp.float32)

    p["layers"] = []
    for _ in range(num_layers):
        w, b = lin(next(k), hidden_dim, hidden_dim)
        g = jnp.ones((1, hidden_dim), jnp.float32)
        be = jnp.zeros((1, hidden_dim), jnp.float32)
        p["layers"].append((w, b, g, be))

    p["mp_w1"], p["mp_b1"] = lin(next(k), hidden_dim, dense_hidden_dim)
    p["mp_w2"], p["mp_b2"] = lin(next(k), dense_hidden_dim, dense_hidden_dim // 2)
    p["mp_w3"], p["mp_b3"] = lin(next(k), dense_hidden_dim // 2, output_dim)
    return p


if __name__ == "__main__":
    NUM_NODES = 16
    INPUT_DIM = 8
    HIDDEN_DIM = 32
    DENSE_HIDDEN_DIM = 32
    OUTPUT_DIM = 4
    NUM_LAYERS = 2

    key = jax.random.PRNGKey(0)
    kx, kp, ke = jax.random.split(key, 3)

    x = jax.random.normal(kx, (NUM_NODES, INPUT_DIM), jnp.float32)

    # deterministic ring graph, both directions
    src = jnp.arange(NUM_NODES, dtype=jnp.int32)
    dst = (src + 1) % NUM_NODES
    edge_index = jnp.stack([jnp.concatenate([src, dst]),
                            jnp.concatenate([dst, src])], axis=0)

    params = init_params(kp, INPUT_DIM, HIDDEN_DIM, DENSE_HIDDEN_DIM,
                         OUTPUT_DIM, NUM_LAYERS)

    # one-time preprocessing: pick row tile, pad N, precompute A_hat, pack params
    TM = _default_tm()
    N_PAD = max(TM, ((NUM_NODES + TM - 1) // TM) * TM)
    a_hat = build_norm_adj(edge_index, NUM_NODES, N_PAD)
    x_padded = jnp.pad(x, ((0, N_PAD - NUM_NODES),
                           (0, LANE - INPUT_DIM))).astype(jnp.bfloat16)
    packed = pack_params(params)

    fwd = jax.jit(functools.partial(gnn_forward_fused,
                                    num_layers=NUM_LAYERS,
                                    hidden_dim=HIDDEN_DIM,
                                    output_dim=OUTPUT_DIM,
                                    num_nodes=NUM_NODES,
                                    tm=TM))
    emb, _, logp = fwd(packed, a_hat, x_padded)
    jax.block_until_ready(emb)
    jax.block_until_ready(logp)

    assert emb.shape == (NUM_NODES, HIDDEN_DIM)
    assert logp.shape == (NUM_NODES, OUTPUT_DIM)
    # log_softmax sanity: probabilities over the valid classes sum to 1
    assert bool(jnp.all(jnp.abs(jnp.sum(jnp.exp(logp), axis=1) - 1.0) < 1e-2))
    print("KERNEL_OK")
</pallas_src>

<mosaic_0001>
module attributes {stable_mosaic.version = 11 : i64} {
  func.func @kernel(%arg0: i32, %arg1: i32, %arg2: memref<128x128xbf16, #tpu.memory_space<vmem>>, %arg3: memref<128x128xbf16, #tpu.memory_space<vmem>>, %arg4: memref<3x128x128xbf16, #tpu.memory_space<vmem>>, %arg5: memref<3x128xf32, #tpu.memory_space<vmem>>, %arg6: memref<3x128xf32, #tpu.memory_space<vmem>>, %arg7: memref<3x128xf32, #tpu.memory_space<vmem>>, %arg8: memref<128x128xbf16, #tpu.memory_space<vmem>>, %arg9: memref<1x128xf32, #tpu.memory_space<vmem>>, %arg10: memref<128x128xf32, #tpu.memory_space<vmem>>, %arg11: memref<128x128xf32, #tpu.memory_space<vmem>>, %arg12: memref<256x128xbf16, #tpu.memory_space<vmem>>) attributes {dimension_semantics = [#tpu.dimension_semantics<arbitrary>, #tpu.dimension_semantics<arbitrary>], iteration_bounds = array<i64: 3, 1>, scalar_prefetch = 0 : i64, scratch_operands = 1 : i64, tpu.core_type = #tpu.core_type<tc>, window_params = [{transform_indices = @transform_0, window_bounds = array<i64: 128, 128>}, {pipeline_mode = #tpu.pipeline_mode<synchronous>, transform_indices = @transform_1, window_bounds = array<i64: 128, 128>}, {pipeline_mode = #tpu.pipeline_mode<synchronous>, transform_indices = @transform_2, window_bounds = array<i64: 3, 128, 128>}, {pipeline_mode = #tpu.pipeline_mode<synchronous>, transform_indices = @transform_3, window_bounds = array<i64: 3, 128>}, {pipeline_mode = #tpu.pipeline_mode<synchronous>, transform_indices = @transform_4, window_bounds = array<i64: 3, 128>}, {pipeline_mode = #tpu.pipeline_mode<synchronous>, transform_indices = @transform_5, window_bounds = array<i64: 3, 128>}, {pipeline_mode = #tpu.pipeline_mode<synchronous>, transform_indices = @transform_6, window_bounds = array<i64: 128, 128>}, {pipeline_mode = #tpu.pipeline_mode<synchronous>, transform_indices = @transform_7, window_bounds = array<i64: 1, 128>}, {transform_indices = @transform_8, window_bounds = array<i64: 128, 128>}, {transform_indices = @transform_9, window_bounds = array<i64: 128, 128>}]} {
    %c0_i32 = arith.constant 0 : i32
    %0 = arith.cmpi eq, %arg0, %c0_i32 : i32
    %c0_i32_0 = arith.constant 0 : i32
    %1 = arith.cmpi eq, %arg1, %c0_i32_0 : i32
    %2 = arith.andi %0, %1 : i1
    %3 = arith.extui %2 : i1 to i32
    %c0_i32_1 = arith.constant 0 : i32
    %4 = arith.cmpi ne, %3, %c0_i32_1 : i32
    scf.if %4 {
      %c0_30 = arith.constant 0 : index
      %c0_31 = arith.constant 0 : index
      %81 = vector.load %arg3[%c0_30, %c0_31] : memref<128x128xbf16, #tpu.memory_space<vmem>>, vector<128x128xbf16>
      %c0_32 = arith.constant 0 : index
      %c0_33 = arith.constant 0 : index
      %82 = vector.load %arg12[%c0_32, %c0_33] : memref<256x128xbf16, #tpu.memory_space<vmem>>, vector<128x128xbf16>
      tpu.vector_store %arg12[%c0_32, %c0_33], %81 {strides = array<i32>} : memref<256x128xbf16, #tpu.memory_space<vmem>>, vector<128x128xbf16>,
    } else {
    }
    %c2_i32 = arith.constant 2 : i32
    %5 = arith.remsi %arg0, %c2_i32 : i32
    %c1_i32 = arith.constant 1 : i32
    %6 = arith.subi %c1_i32, %5 : i32
    %c128_i32 = arith.constant 128 : i32
    %7 = arith.muli %5, %c128_i32 : i32
    %8 = tpu.assume_multiple %7, 128 : i32
    %c128_i32_2 = arith.constant 128 : i32
    %9 = arith.muli %6, %c128_i32_2 : i32
    %c128_i32_3 = arith.constant 128 : i32
    %10 = arith.muli %arg1, %c128_i32_3 : i32
    %11 = arith.addi %9, %10 : i32
    %12 = tpu.assume_multiple %11, 128 : i32
    %13 = arith.index_cast %8 : i32 to index
    %c0 = arith.constant 0 : index
    %14 = vector.load %arg12[%13, %c0] : memref<256x128xbf16, #tpu.memory_space<vmem>>, vector<128x128xbf16>
    %c0_4 = arith.constant 0 : index
    %c0_5 = arith.constant 0 : index
    %15 = vector.load %arg2[%c0_4, %c0_5] : memref<128x128xbf16, #tpu.memory_space<vmem>>, vector<128x128xbf16>
    %cst = arith.constant dense<0.000000e+00> : vector<128x128xf32>
    %16 = tpu.matmul %15, %14, %cst {dimension_numbers = #tpu.dot_dimension_numbers<[1], [0], [0], [1], [0, 0, 1, 1], [], []>} : vector<128x128xbf16>, vector<128x128xbf16>, vector<128x128xf32> -> vector<128x128xf32>
    %17 = arith.truncf %16 : vector<128x128xf32> to vector<128x128xbf16>
    %18 = arith.index_cast %arg0 : i32 to index
    %c0_6 = arith.constant 0 : index
    %c0_7 = arith.constant 0 : index
    %19 = vector.load %arg4[%18, %c0_6, %c0_7] : memref<3x128x128xbf16, #tpu.memory_space<vmem>>, vector<1x128x128xbf16>
    %20 = vector.shape_cast %19 : vector<1x128x128xbf16> to vector<128x128xbf16>
    %cst_8 = arith.constant dense<0.000000e+00> : vector<128x128xf32>
    %21 = tpu.matmul %17, %20, %cst_8 {dimension_numbers = #tpu.dot_dimension_numbers<[1], [0], [0], [1], [0, 0, 1, 1], [], []>} : vector<128x128xbf16>, vector<128x128xbf16>, vector<128x128xf32> -> vector<128x128xf32>
    %22 = arith.index_cast %arg0 : i32 to index
    %c0_9 = arith.constant 0 : index
    %23 = vector.load %arg5[%22, %c0_9] : memref<3x128xf32, #tpu.memory_space<vmem>>, vector<1x128xf32>
    %24 = vector.broadcast %23 : vector<1x128xf32> to vector<128x128xf32>
    %25 = arith.addf %21, %24 : vector<128x128xf32>
    %26 = tpu.iota {dimensions = array<i32: 1>} : vector<1x128xi32>
    %c32_i32 = arith.constant 32 : i32
    %27 = vector.broadcast %c32_i32 : i32 to vector<1x128xi32>
    %28 = arith.cmpi slt, %26, %27 : vector<1x128xi32>
    %29 = arith.extui %28 : vector<1x128xi1> to vector<1x128xi32>
    %30 = arith.sitofp %29 : vector<1x128xi32> to vector<1x128xf32>
    %cst_10 = arith.constant 0.000000e+00 : f32
    %31 = vector.broadcast %cst_10 : f32 to vector<128x128xf32>
    %32 = arith.maximumf %25, %31 : vector<128x128xf32>
    %33 = vector.broadcast %30 : vector<1x128xf32> to vector<128x128xf32>
    %34 = arith.mulf %32, %33 : vector<128x128xf32>
    %cst_11 = arith.constant dense<0.000000e+00> : vector<128xf32>
    %35 = vector.multi_reduction <add>, %34, %cst_11 [1] : vector<128x128xf32> to vector<128xf32>
    %36 = vector.shape_cast %35 : vector<128xf32> to vector<128x1xf32>
    %cst_12 = arith.constant 3.125000e-02 : f32
    %37 = vector.broadcast %cst_12 : f32 to vector<128x1xf32>
    %38 = arith.mulf %36, %37 : vector<128x1xf32>
    %39 = vector.broadcast %38 : vector<128x1xf32> to vector<128x128xf32>
    %40 = arith.subf %32, %39 : vector<128x128xf32>
    %41 = arith.mulf %40, %40 : vector<128x128xf32>
    %42 = vector.broadcast %30 : vector<1x128xf32> to vector<128x128xf32>
    %43 = arith.mulf %41, %42 : vector<128x128xf32>
    %cst_13 = arith.constant dense<0.000000e+00> : vector<128xf32>
    %44 = vector.multi_reduction <add>, %43, %cst_13 [1] : vector<128x128xf32> to vector<128xf32>
    %45 = vector.shape_cast %44 : vector<128xf32> to vector<128x1xf32>
    %cst_14 = arith.constant 3.125000e-02 : f32
    %46 = vector.broadcast %cst_14 : f32 to vector<128x1xf32>
    %47 = arith.mulf %45, %46 : vector<128x1xf32>
    %cst_15 = arith.constant 9.99999974E-6 : f32
    %48 = vector.broadcast %cst_15 : f32 to vector<128x1xf32>
    %49 = arith.addf %47, %48 : vector<128x1xf32>
    %50 = math.rsqrt %49 : vector<128x1xf32>
    %51 = vector.broadcast %50 : vector<128x1xf32> to vector<128x128xf32>
    %52 = arith.mulf %40, %51 : vector<128x128xf32>
    %53 = arith.index_cast %arg0 : i32 to index
    %c0_16 = arith.constant 0 : index
    %54 = vector.load %arg6[%53, %c0_16] : memref<3x128xf32, #tpu.memory_space<vmem>>, vector<1x128xf32>
    %55 = vector.broadcast %54 : vector<1x128xf32> to vector<128x128xf32>
    %56 = arith.mulf %52, %55 : vector<128x128xf32>
    %57 = arith.index_cast %arg0 : i32 to index
    %c0_17 = arith.constant 0 : index
    %58 = vector.load %arg7[%57, %c0_17] : memref<3x128xf32, #tpu.memory_space<vmem>>, vector<1x128xf32>
    %59 = vector.broadcast %58 : vector<1x128xf32> to vector<128x128xf32>
    %60 = arith.addf %56, %59 : vector<128x128xf32>
    %61 = arith.truncf %60 : vector<128x128xf32> to vector<128x128xbf16>
    %62 = arith.index_cast %12 : i32 to index
    %c0_18 = arith.constant 0 : index
    %63 = vector.load %arg12[%62, %c0_18] : memref<256x128xbf16, #tpu.memory_space<vmem>>, vector<128x128xbf16>
    tpu.vector_store %arg12[%62, %c0_18], %61 {strides = array<i32>} : memref<256x128xbf16, #tpu.memory_space<vmem>>, vector<128x128xbf16>,
    %c0_19 = arith.constant 0 : index
    %c0_20 = arith.constant 0 : index
    %64 = vector.load %arg10[%c0_19, %c0_20] : memref<128x128xf32, #tpu.memory_space<vmem>>, vector<128x128xf32>
    tpu.vector_store %arg10[%c0_19, %c0_20], %25 {strides = array<i32>} : memref<128x128xf32, #tpu.memory_space<vmem>>, vector<128x128xf32>,
    %c0_21 = arith.constant 0 : index
    %c0_22 = arith.constant 0 : index
    %65 = vector.load %arg8[%c0_21, %c0_22] : memref<128x128xbf16, #tpu.memory_space<vmem>>, vector<128x128xbf16>
    %cst_23 = arith.constant dense<0.000000e+00> : vector<128x128xf32>
    %66 = tpu.matmul %61, %65, %cst_23 {dimension_numbers = #tpu.dot_dimension_numbers<[1], [0], [0], [1], [0, 0, 1, 1], [], []>} : vector<128x128xbf16>, vector<128x128xbf16>, vector<128x128xf32> -> vector<128x128xf32>
    %c0_24 = arith.constant 0 : index
    %c0_25 = arith.constant 0 : index
    %67 = vector.load %arg9[%c0_24, %c0_25] : memref<1x128xf32, #tpu.memory_space<vmem>>, vector<1x128xf32>
    %68 = vector.broadcast %67 : vector<1x128xf32> to vector<128x128xf32>
    %69 = arith.addf %66, %68 : vector<128x128xf32>
    %cst_26 = arith.constant dense<0xFF800000> : vector<128xf32>
    %70 = vector.multi_reduction <maximumf>, %69, %cst_26 [1] : vector<128x128xf32> to vector<128xf32>
    %71 = vector.shape_cast %70 : vector<128xf32> to vector<128x1xf32>
    %72 = vector.broadcast %71 : vector<128x1xf32> to vector<128x128xf32>
    %73 = arith.subf %69, %72 : vector<128x128xf32>
    %74 = math.exp %73 : vector<128x128xf32>
    %cst_27 = arith.constant dense<0.000000e+00> : vector<128xf32>
    %75 = vector.multi_reduction <add>, %74, %cst_27 [1] : vector<128x128xf32> to vector<128xf32>
    %76 = vector.shape_cast %75 : vector<128xf32> to vector<128x1xf32>
    %77 = math.log %76 : vector<128x1xf32>
    %78 = vector.broadcast %77 : vector<128x1xf32> to vector<128x128xf32>
    %79 = arith.subf %73, %78 : vector<128x128xf32>
    %c0_28 = arith.constant 0 : index
    %c0_29 = arith.constant 0 : index
    %80 = vector.load %arg11[%c0_28, %c0_29] : memref<128x128xf32, #tpu.memory_space<vmem>>, vector<128x128xf32>
    tpu.vector_store %arg11[%c0_28, %c0_29], %79 {strides = array<i32>} : memref<128x128xf32, #tpu.memory_space<vmem>>, vector<128x128xf32>,
    return
  }
  func.func @transform_0(%arg0: i32, %arg1: i32) -> (i32, i32) {
    %c0_i32 = arith.constant 0 : i32
    %c0_i32_0 = arith.constant 0 : i32
    return %arg1, %c0_i32 : i32, i32
  }
  func.func @transform_1(%arg0: i32, %arg1: i32) -> (i32, i32) {
    %c0_i32 = arith.constant 0 : i32
    %c0_i32_0 = arith.constant 0 : i32
    %c0_i32_1 = arith.constant 0 : i32
    return %c0_i32, %c0_i32_0 : i32, i32
  }
  func.func @transform_2(%arg0: i32, %arg1: i32) -> (i32, i32, i32) {
    %c0_i32 = arith.constant 0 : i32
    %c0_i32_0 = arith.constant 0 : i32
    %c0_i32_1 = arith.constant 0 : i32
    %c0_i32_2 = arith.constant 0 : i32
    return %c0_i32, %c0_i32_0, %c0_i32_1 : i32, i32, i32
  }
  func.func @transform_3(%arg0: i32, %arg1: i32) -> (i32, i32) {
    %c0_i32 = arith.constant 0 : i32
    %c0_i32_0 = arith.constant 0 : i32
    %c0_i32_1 = arith.constant 0 : i32
    return %c0_i32, %c0_i32_0 : i32, i32
  }
  func.func @transform_4(%arg0: i32, %arg1: i32) -> (i32, i32) {
    %c0_i32 = arith.constant 0 : i32
    %c0_i32_0 = arith.constant 0 : i32
    %c0_i32_1 = arith.constant 0 : i32
    return %c0_i32, %c0_i32_0 : i32, i32
  }
  func.func @transform_5(%arg0: i32, %arg1: i32) -> (i32, i32) {
    %c0_i32 = arith.constant 0 : i32
    %c0_i32_0 = arith.constant 0 : i32
    %c0_i32_1 = arith.constant 0 : i32
    return %c0_i32, %c0_i32_0 : i32, i32
  }
  func.func @transform_6(%arg0: i32, %arg1: i32) -> (i32, i32) {
    %c0_i32 = arith.constant 0 : i32
    %c0_i32_0 = arith.constant 0 : i32
    %c0_i32_1 = arith.constant 0 : i32
    return %c0_i32, %c0_i32_0 : i32, i32
  }
  func.func @transform_7(%arg0: i32, %arg1: i32) -> (i32, i32) {
    %c0_i32 = arith.constant 0 : i32
    %c0_i32_0 = arith.constant 0 : i32
    %c0_i32_1 = arith.constant 0 : i32
    return %c0_i32, %c0_i32_0 : i32, i32
  }
  func.func @transform_8(%arg0: i32, %arg1: i32) -> (i32, i32) {
    %c0_i32 = arith.constant 0 : i32
    %c0_i32_0 = arith.constant 0 : i32
    return %arg1, %c0_i32 : i32, i32
  }
  func.func @transform_9(%arg0: i32, %arg1: i32) -> (i32, i32) {
    %c0_i32 = arith.constant 0 : i32
    %c0_i32_0 = arith.constant 0 : i32
    return %arg1, %c0_i32 : i32, i32
  }
}

</mosaic_0001>

<bundles_post_ra>
// kernel: gnn_forward_fused.1
= control target key start
LH: loop header
LB: loop body
LE: loop exit
PB: predicated region body
PF: predicated region fallthrough
CT: control target
= control target key end

     0   :  { %15 = vsyncpa [#allocation4], 0  ;;  %s3256_s0 = inlined_call_operand.hbm [shape: bf16[128,128], index: 0, kind: input, shape index: {}]   ;;  %s3257_s1 = inlined_call_operand.hbm [shape: bf16[128,128], index: 1, kind: input, shape index: {}]   ;;  %s3258_s2 = inlined_call_operand.hbm [shape: bf16[3,128,128], index: 2, kind: input, shape index: {}]   ;;  %s3259_s3 = inlined_call_operand.hbm [shape: f32[3,128], index: 3, kind: input, shape index: {}]   ;;  %s3260_s4 = inlined_call_operand.hbm [shape: f32[3,128], index: 4, kind: input, shape index: {}]   ;;  %s3261_s5 = inlined_call_operand.hbm [shape: f32[3,128], index: 5, kind: input, shape index: {}]   ;;  %s3262_s6 = inlined_call_operand.hbm [shape: bf16[128,128], index: 6, kind: input, shape index: {}]   ;;  %s3263_s7 = inlined_call_operand.vmem [shape: f32[1,128], index: 7, kind: input, shape index: {}]   ;;  %s3264_s8 = inlined_call_operand.vmem [shape: f32[128,128], index: 8, kind: output, shape index: {0}]   ;;  %s3265_s9 = inlined_call_operand.vmem [shape: f32[128,128], index: 9, kind: output, shape index: {1}]  }
   0x1   :  { %16 = vsyncpa [#allocation6], 0 }
   0x2   :  { %17 = vsyncpa [#allocation9], 0 }
   0x3   :  { %18 = vsyncpa [#allocation12], 0  ;;  %s2597_s30 = smov 0   ;;  %s2599_s10 = smov 0  }
   0x4   :  { %s2601_s11 = smov 0  }
   0x5 LB: > { %s1780_s12 = sadd.s32 4294967295, %s2535_s11   ;;  %p1781_p0 = scmp.ge.s32.totalorder %s2535_s11, 1  ;;  %s2535_s11 = sphi %s2601_s11, %s24_s11   ;;  %s2531_s10 = sphi %s2599_s10, %s3271_s10   ;;  %s2527_s30 = sphi %s2597_s30, %s3270_s30  }
   0x6   : > { %p266_p1 = scmp.lt.s32.totalorder %s2535_s11, 4  ;;  %p2615_p2 = scmp.eq.s32.totalorder %s1780_s12, 0 }
   0x7   : > { %s2537_s15 = smov [#allocation5]   ;;  %s2538_s17 = smov [#allocation8]  }
   0x8   : > { %p2619_p3 = pnand %p1781_p0, %p266_p1  ;;  %s294_s16 = sshll.u32 %s2537_s15, 4  ;;  %s295_s16 = int_to_ptr.vmem [resolvable:$true] %s294_s16 }
   0x9   : > { %s321_s18 = sshll.u32 %s2538_s17, 4  ;;  %s2539_s20 = smov [#allocation11]   ;;  %s322_s18 = int_to_ptr.vmem [resolvable:$true] %s321_s18 }
   0xa   : > { %p2117_p4 = pneg %p2619_p3  ;;  %s343_s21 = sshll.u32 %s2539_s20, 4  ;;  %s2631_s21 = int_to_ptr.vmem [resolvable:$true] %s343_s21 }
   0xb   : > { %s2326_s23 = scalar_lea.vmem %s295_s16, 1024  ;;  %p2334_p10 = scmp.lt.s32.totalorder %s295_s16, %s295_s16 }
   0xc   : > { %p2627_p5 = pnand %p2615_p2, %p2117_p4  ;;  %p2327_p7 = scmp.ne.s32.totalorder %s295_s16, %s2326_s23 }
   0xd   : > { %p2335_p11 = scmp.lt.s32.totalorder %s2326_s23, %s2326_s23 }
   0xe   : > { %p2635_p6 = pneg %p2627_p5 }
   0xf   : > { %p2336_p12 = por %p2335_p11, %p2334_p10 }
  0x10   : > { %p2329_p8 = pnand %p2327_p7, %p2635_p6 }
  0x12   : > { %p2330_p9 = pneg %p2329_p8 }
  0x14   : > { %p2337_p13 = pnand %p2336_p12, %p2330_p9 }
  0x16   : > { %2340 = shalt.err (!%p2337_p13)
}
  0x17   : > { %s2540_s24 = smov 64   ;;  %s2541_s25 = smov 4  }
  0x18   : > { %2123 = dma.hbm_to_vmem [thread:$0]  (!%p2627_p5), %s3257_s1, 1024, %s295_s16, [#allocation6], %s2540_s24, %s2540_s24, %s2541_s25  }
  0x19   : > { %s2352_s28 = scalar_lea.vmem %s322_s18, 64  ;;  %p2360_p7 = scmp.lt.s32.totalorder %s322_s18, %s322_s18 }
  0x1a   : > { %p2353_p0 = scmp.ne.s32.totalorder %s322_s18, %s2352_s28  ;;  %p2361_p8 = scmp.lt.s32.totalorder %s2352_s28, %s2352_s28 }
  0x1c   : > { %p2355_p1 = pnand %p2353_p0, %p2635_p6  ;;  %p2362_p9 = por %p2361_p8, %p2360_p7 }
  0x1e   : > { %p2356_p4 = pneg %p2355_p1 }
  0x20   : > { %p2363_p10 = pnand %p2362_p9, %p2356_p4 }
  0x22   : > { %2366 = shalt.err (!%p2363_p10)
}
  0x23   : > { %2129 = dma.hbm_to_vmem [thread:$0]  (!%p2627_p5), %s3259_s3, 64, %s322_s18, [#allocation9]  }
  0x24   : > { %s2378_s15 = scalar_lea.vmem %s2631_s21, 64  ;;  %p2386_p0 = scmp.lt.s32.totalorder %s2631_s21, %s2631_s21 }
  0x25   : > { %p2379_p11 = scmp.ne.s32.totalorder %s2631_s21, %s2378_s15  ;;  %p2387_p1 = scmp.lt.s32.totalorder %s2378_s15, %s2378_s15 }
  0x27   : > { %p2381_p12 = pnand %p2379_p11, %p2635_p6  ;;  %p2388_p4 = por %p2387_p1, %p2386_p0 }
  0x29   : > { %p2382_p13 = pneg %p2381_p12 }
  0x2b   : > { %p2389_p7 = pnand %p2388_p4, %p2382_p13 }
  0x2d   : > { %2392 = shalt.err (!%p2389_p7)
}
  0x2e   : > { %2135 = dma.hbm_to_vmem [thread:$0]  (!%p2627_p5), %s3261_s5, 64, %s2631_s21, [#allocation12]  }
  0x2f   : > { %s36_s18 = sadd.s32 1, %s2531_s10  ;;  %s2542_s20 = smov [#allocation3]  }
  0x30   : > { %p38_p8 = scmp.ge.s32.totalorder %s36_s18, 3  ;;  %s281_s23 = sshll.u32 %s2542_s20, 4  ;;  %s282_s23 = int_to_ptr.vmem [resolvable:$true] %s281_s23 }
  0x31   : > { %s2404_s26 = scalar_lea.vmem %s282_s23, 1024  ;;  %p2412_p12 = scmp.lt.s32.totalorder %s282_s23, %s282_s23 }
  0x32   : > { %s3273_s18 = smov (%p38_p8, %s36_s18), 0  ;;  %p2405_p9 = scmp.ne.s32.totalorder %s282_s23, %s2404_s26 }
  0x33   : > { %p2413_p13 = scmp.lt.s32.totalorder %s2404_s26, %s2404_s26 }
  0x34   : > { %p2407_p10 = pnand %p2405_p9, %p2635_p6 }
  0x35   : > { %p2414_p0 = por %p2413_p13, %p2412_p12 }
  0x36   : > { %p2408_p11 = pneg %p2407_p10 }
  0x38   : > { %p2415_p1 = pnand %p2414_p0, %p2408_p11 }
  0x3a   : > { %2418 = shalt.err (!%p2415_p1)
}
  0x3b   : > { %2120 = dma.hbm_to_vmem [thread:$0]  (!%p2627_p5), %s3256_s0, 1024, %s282_s23, [#allocation4], %s2540_s24, %s2540_s24, %s2541_s25  }
  0x3c   : > { %s2543_s28 = smov [#allocation7]   ;;  %s2544_s12 = smov [#allocation10]  }
  0x3d   : > { %s307_s29 = sshll.u32 %s2543_s28, 4  ;;  %s332_s15 = sshll.u32 %s2544_s12, 4  ;;  %s308_s29 = int_to_ptr.vmem [resolvable:$true] %s307_s29  ;;  %s333_s15 = int_to_ptr.vmem [resolvable:$true] %s332_s15 }
  0x3e   : > { %s2430_s16 = scalar_lea.vmem %s308_s29, 3072  ;;  %p2438_p9 = scmp.lt.s32.totalorder %s308_s29, %s308_s29 }
  0x3f   : > { %p2431_p4 = scmp.ne.s32.totalorder %s308_s29, %s2430_s16  ;;  %p2439_p10 = scmp.lt.s32.totalorder %s2430_s16, %s2430_s16 }
  0x41   : > { %p2433_p7 = pnand %p2431_p4, %p2635_p6  ;;  %p2440_p11 = por %p2439_p10, %p2438_p9 }
  0x43   : > { %p2434_p8 = pneg %p2433_p7 }
  0x45   : > { %p2441_p12 = pnand %p2440_p11, %p2434_p8 }
  0x47   : > { %2444 = shalt.err (!%p2441_p12)
}
  0x48   : > { %2126 = dma.hbm_to_vmem [thread:$0]  (!%p2627_p5), %s3258_s2, 3072, %s308_s29, [#allocation6], %s2540_s24, %s2540_s24, %s2541_s25  }
  0x49   : > { %s2456_s23 = scalar_lea.vmem %s333_s15, 64  ;;  %p2464_p4 = scmp.lt.s32.totalorder %s333_s15, %s333_s15 }
  0x4a   : > { %p2457_p13 = scmp.ne.s32.totalorder %s333_s15, %s2456_s23  ;;  %p2465_p7 = scmp.lt.s32.totalorder %s2456_s23, %s2456_s23 }
  0x4c   : > { %p2459_p0 = pnand %p2457_p13, %p2635_p6  ;;  %p2466_p8 = por %p2465_p7, %p2464_p4 }
  0x4e   : > { %p2460_p1 = pneg %p2459_p0 }
  0x50   : > { %p2467_p9 = pnand %p2466_p8, %p2460_p1 }
  0x52   : > { %2470 = shalt.err (!%p2467_p9)
}
  0x53   : > { %2132 = dma.hbm_to_vmem [thread:$0]  (!%p2627_p5), %s3260_s4, 64, %s333_s15, [#allocation9]  }
  0x54   : > { %s2545_s27 = smov [#allocation13]  }
  0x55   : > { %s353_s28 = sshll.u32 %s2545_s27, 4  ;;  %s354_s28 = int_to_ptr.vmem [resolvable:$true] %s353_s28 }
  0x56   : > { %s2482_s29 = scalar_lea.vmem %s354_s28, 1024  ;;  %p2490_p13 = scmp.lt.s32.totalorder %s354_s28, %s354_s28 }
  0x57   : > { %p2483_p10 = scmp.ne.s32.totalorder %s354_s28, %s2482_s29  ;;  %p2491_p0 = scmp.lt.s32.totalorder %s2482_s29, %s2482_s29 }
  0x59   : > { %p2485_p11 = pnand %p2483_p10, %p2635_p6  ;;  %p2492_p4 = por %p2491_p0, %p2490_p13 }
  0x5b   : > { %p2486_p12 = pneg %p2485_p11 }
  0x5d   : > { %p2493_p1 = pnand %p2492_p4, %p2486_p12 }
  0x5f   : > { %2496 = shalt.err (!%p2493_p1)
}
  0x60   : > { %2138 = dma.hbm_to_vmem [thread:$0]  (!%p2627_p5), %s3262_s6, 1024, %s354_s28, [#allocation12], %s2540_s24, %s2540_s24, %s2541_s25  }
  0x61   : > { %372 = sbr.rel (%p2619_p3) target bundleno = 1431 (0x597), region = 52 }
  0x66   : > { %2510 = dma.done.wait (%p2615_p2), [#allocation4], 1024  }
  0x67   : > { %2512 = vsyncadd (%p2615_p2), [#allocation4], 4294966272 }
  0x68   : > { %2514 = dma.done.wait (%p2615_p2), [#allocation6], 4096  }
  0x69   : > { %2516 = vsyncadd (%p2615_p2), [#allocation6], 4294963200 }
  0x6a   : > { %2518 = dma.done.wait (%p2615_p2), [#allocation9], 128  }
  0x6b   : > { %2520 = vsyncadd (%p2615_p2), [#allocation9], 4294967168 }
  0x6c   : > { %2522 = dma.done.wait (%p2615_p2), [#allocation12], 1088  }
  0x6d   : > { %2524 = vsyncadd (%p2615_p2), [#allocation12], 4294966208  ;;  %p446_p3 = scmp.eq.s32.totalorder %s2527_s30, 0 }
  0x6e   : > { %v452_v0 = vld [vmem:[#allocation5] sm:$0xff] (%p446_p3)   ;;  %v454_v1 = vld [vmem:[#allocation5 + $0x8] sm:$0xff] (%p446_p3)   ;;  %v456_v2 = vld [vmem:[#allocation5 + $0x10] sm:$0xff] (%p446_p3)  }
  0x6f   : > { %451 = sbr.rel (!%p446_p3) target bundleno = 116 (0x74), region = 84  ;;  %468 = vst [vmem:[#allocation2] sm:$0xff] (%p446_p3), %v452_v0   ;;  %470 = vst [vmem:[#allocation2 + $0x8] sm:$0xff] (%p446_p3), %v454_v1   ;;  %v458_v3 = vld [vmem:[#allocation5 + $0x18] sm:$0xff] (%p446_p3)   ;;  %v460_v4 = vld [vmem:[#allocation5 + $0x20] sm:$0xff] (%p446_p3)  }
  0x70   : > { %472 = vst [vmem:[#allocation2 + $0x10] sm:$0xff] (%p446_p3), %v456_v2   ;;  %v462_v5 = vld [vmem:[#allocation5 + $0x28] sm:$0xff] (%p446_p3)   ;;  %474 = vst [vmem:[#allocation2 + $0x18] sm:$0xff] (%p446_p3), %v458_v3   ;;  %v464_v6 = vld [vmem:[#allocation5 + $0x30] sm:$0xff] (%p446_p3)  }
  0x71   : > { %476 = vst [vmem:[#allocation2 + $0x20] sm:$0xff] (%p446_p3), %v460_v4   ;;  %478 = vst [vmem:[#allocation2 + $0x28] sm:$0xff] (%p446_p3), %v462_v5   ;;  %v466_v7 = vld [vmem:[#allocation5 + $0x38] sm:$0xff] (%p446_p3)  }
  0x72   : > { %480 = vst [vmem:[#allocation2 + $0x30] sm:$0xff] (%p446_p3), %v464_v6   ;;  %482 = vst [vmem:[#allocation2 + $0x38] sm:$0xff] (%p446_p3), %v466_v7  }
  0x74 PF: > { %p484_p2 = scmp.lt.s32.totalorder %s2527_s30, 0  ;;  %s485_s13 = ssub.s32 0, %s2527_s30  ;;  %v2195_v8 = vld [vmem:[#allocation3] sm:$0xff]   ;;  %v2196_v23 = vld [vmem:[#allocation3 + $0x8] sm:$0xff]   ;;  %v2197_v24 = vld [vmem:[#allocation3 + $0x10] sm:$0xff]   ;;  %v902_v56 = vlaneseq  ;;  %v2546_v62 = vmov 0.0  }
  0x75   : > { %s1798_s14 = smin.u32 %s2527_s30, %s485_s13  ;;  %1993 = vmatprep.mubr.bf16.mxu0 %v2195_v8  ;;  %s1865_s24 = sshll.u32 %s2527_s30, 6  ;;  %v2198_v25 = vld [vmem:[#allocation3 + $0x18] sm:$0xff]   ;;  %v2199_v26 = vld [vmem:[#allocation3 + $0x20] sm:$0xff]   ;;  %v2200_v27 = vld [vmem:[#allocation3 + $0x28] sm:$0xff]  }
  0x76   : > { %s487_s19 = sand.u32 1, %s1798_s14   ;;  %s2734_s20 = scalar_lea.vmem [#allocation7], %s1865_s24  ;;  %v2201_v28 = vld [vmem:[#allocation3 + $0x30] sm:$0xff]   ;;  %v2202_v29 = vld [vmem:[#allocation3 + $0x38] sm:$0xff]   ;;  %v903_v57 = vand.u32 127, %v902_v56 }
  0x77   : > { %s488_s22 = ssub.s32 0, %s487_s19  ;;  %v2203_v9 = vld [vmem:[%s2734_s20 + $0x38] sm:$0xff]   ;;  %v2204_v14 = vld [vmem:[%s2734_s20 + $0x30] sm:$0xff]   ;;  %v2205_v15 = vld [vmem:[%s2734_s20 + $0x28] sm:$0xff]   ;;  %s751_s26 = scalar_lea.vmem [#allocation8], %s2527_s30 }
  0x78   : > { %s3275_s22 = smov (!%p484_p2, %s488_s22), %s487_s19  ;;  %2009 = vmatprep.subr.bf16.mxu1 %v2203_v9  ;;  %v2206_v17 = vld [vmem:[%s2734_s20 + $0x20] sm:$0xff]   ;;  %v2207_v19 = vld [vmem:[%s2734_s20 + $0x18] sm:$0xff]   ;;  %v2208_v21 = vld [vmem:[%s2734_s20 + $0x10] sm:$0xff]   ;;  %vm904_vm0 = vcmp.lt.s32.totalorder %v903_v57, 32  ;;  %s1131_s28 = scalar_lea.vmem [#allocation10], %s2527_s30 }
  0x79   : > { %s1799_s25 = sshll.u32 %s3275_s22, 7  ;;  %2010 = vmatpush3.bf16.msra.mxu1 %v2203_v9  ;;  %v2209_v30 = vld [vmem:[%s2734_s20 + $0x8] sm:$0xff]   ;;  %v2210_v31 = vld [vmem:[%s2734_s20] sm:$0xff]   ;;  %v2760_v63 = vsel %vm904_vm0, 1.0, %v2546_v62  ;;  %s490_s21 = ssub.s32 1, %s3275_s22 }
  0x7a   : > { %s495_s16 = sshra.s32 %s1799_s25, 3  ;;  %2011 = vmatprep.subr.bf16.mxu1 %v2204_v14  ;;  %v2755_v58 = vld [vmem:[%s751_s26] ss:$0 sm:$0xff]  ;;  %s1800_s27 = sshll.u32 %s490_s21, 7 }
  0x7b   : > { %s1801_s17 = sshll.u32 %s495_s16, 2  ;;  %s1239_s22 = sshra.s32 %s1800_s27, 3 }
  0x7c   : > { %s2737_s23 = scalar_lea.vmem [#allocation2], %s1801_s17  ;;  %s1153_s29 = scalar_lea.vmem [#allocation11], %s2527_s30 }
  0x7d   : > { %v2187_v10 = vld [vmem:[%s2737_s23 + $0x38] sm:$0xff]   ;;  %v2188_v11 = vld [vmem:[%s2737_s23 + $0x30] sm:$0xff]   ;;  %v2189_v12 = vld [vmem:[%s2737_s23 + $0x28] sm:$0xff]   ;;  %2012 = vmatpush3.bf16.msra.mxu1 %v2204_v14  ;;  %s1848_s12 = sshll.u32 %s1239_s22, 2 }
  0x7e   : > { %1977 = vmatprep.subr.bf16.mxu0 %v2187_v10  ;;  %v2190_v13 = vld [vmem:[%s2737_s23 + $0x20] sm:$0xff]   ;;  %v2191_v16 = vld [vmem:[%s2737_s23 + $0x18] sm:$0xff]   ;;  %2013 = vmatprep.subr.bf16.mxu1 %v2205_v15  ;;  %v2192_v18 = vld [vmem:[%s2737_s23 + $0x10] sm:$0xff]   ;;  %s3066_s30 = scalar_lea.vmem [#allocation2], %s1848_s12 }
  0x7f   : > { %1978 = vmatpush3.bf16.msra.mxu0 %v2187_v10  ;;  %v2193_v20 = vld [vmem:[%s2737_s23 + $0x8] sm:$0xff]   ;;  %v2194_v22 = vld [vmem:[%s2737_s23] sm:$0xff]  }
  0x80   : > { %1979 = vmatprep.subr.bf16.mxu0 %v2188_v11 }
  0x81   : > { %2014 = vmatpush3.bf16.msra.mxu1 %v2205_v15 }
  0x82   : > { %2015 = vmatprep.subr.bf16.mxu1 %v2206_v17 }
  0x83   : > { %1980 = vmatpush3.bf16.msra.mxu0 %v2188_v11 }
  0x84   : > { %1981 = vmatprep.subr.bf16.mxu0 %v2189_v12 }
  0x85   : > { %2016 = vmatpush3.bf16.msra.mxu1 %v2206_v17 }
  0x86   : > { %2017 = vmatprep.subr.bf16.mxu1 %v2207_v19 }
  0x87   : > { %1982 = vmatpush3.bf16.msra.mxu0 %v2189_v12 }
  0x88   : > { %1983 = vmatprep.subr.bf16.mxu0 %v2190_v13 }
  0x89   : > { %2018 = vmatpush3.bf16.msra.mxu1 %v2207_v19 }
  0x8a   : > { %2019 = vmatprep.subr.bf16.mxu1 %v2208_v21 }
  0x8b   : > { %1984 = vmatpush3.bf16.msra.mxu0 %v2190_v13 }
  0x8c   : > { %1985 = vmatprep.subr.bf16.mxu0 %v2191_v16 }
  0x8d   : > { %2020 = vmatpush3.bf16.msra.mxu1 %v2208_v21 }
  0x8e   : > { %2021 = vmatprep.subr.bf16.mxu1 %v2209_v30 }
  0x8f   : > { %1986 = vmatpush3.bf16.msra.mxu0 %v2191_v16 }
  0x90   : > { %1987 = vmatprep.subr.bf16.mxu0 %v2192_v18 }
  0x91   : > { %2022 = vmatpush3.bf16.msra.mxu1 %v2209_v30 }
  0x92   : > { %2023 = vmatprep.subr.bf16.mxu1 %v2210_v31 }
  0x93   : > { %1988 = vmatpush3.bf16.msra.mxu0 %v2192_v18 }
  0x94   : > { %1989 = vmatprep.subr.bf16.mxu0 %v2193_v20 }
  0x95   : > { %2024 = vmatpush3.bf16.msra.mxu1 %v2210_v31 }
  0x97   : > { %1990 = vmatpush3.bf16.msra.mxu0 %v2193_v20 }
  0x98   : > { %1991 = vmatprep.subr.bf16.mxu0 %v2194_v22 }
  0x9b   : > { %1992 = vmatpush3.bf16.msra.mxu0 %v2194_v22 }
  0x9e   : > { %1994 = vmatmul.mubr.bf16.vlgmr.msra.gmra.mxu0 %v2196_v23 }
  0x9f   : > { %1997 = vmatprep.mubr.bf16.mxu0 %v2197_v24 }
  0xa6   : > { %1998 = vmatmul.mubr.bf16.gmra.mxu0 %v2198_v25 }
  0xa7   : > { %2001 = vmatprep.mubr.bf16.mxu0 %v2199_v26 }
  0xae   : > { %2002 = vmatmul.mubr.bf16.gmra.mxu0 %v2200_v27 }
  0xaf   : > { %2005 = vmatprep.mubr.bf16.mxu0 %v2201_v28 }
  0xb6   : > { %2006 = vmatmul.mubr.bf16.gmra.mxu0 %v2202_v29 }
 0x15e   : > { %v1995_v32 = vpop.f32.mrf.mxu0 }
 0x160   : > { %v661_v33 = vpop.f32.mrf.mxu0 }
 0x162   : > { %v1996_v34 = vpop.f32.mrf.mxu0 }
 0x163   : > { %v725_v37 = vpack.c.bf16 %v1996_v34, %v1995_v32 }
 0x164   : > { %v664_v35 = vpop.f32.mrf.mxu0 }
 0x165   : > { %v724_v36 = vpack.c.bf16 %v664_v35, %v661_v33 }
 0x166   : > { %v1999_v38 = vpop.f32.mrf.mxu0 }
 0x167   : > { %2025 = vmatprep.mubr.bf16.mxu1 %v724_v36 }
 0x168   : > { %v677_v39 = vpop.f32.mrf.mxu0  ;;  %2026 = vmatmul.mubr.bf16.vlgmr.msra.gmra.mxu1 %v725_v37 }
 0x16a   : > { %v2000_v40 = vpop.f32.mrf.mxu0 }
 0x16b   : > { %v727_v43 = vpack.c.bf16 %v2000_v40, %v1999_v38 }
 0x16c   : > { %v680_v41 = vpop.f32.mrf.mxu0 }
 0x16d   : > { %v726_v42 = vpack.c.bf16 %v680_v41, %v677_v39 }
 0x16e   : > { %v2003_v44 = vpop.f32.mrf.mxu0 }
 0x16f   : > { %2029 = vmatprep.mubr.bf16.mxu1 %v726_v42 }
 0x170   : > { %v693_v45 = vpop.f32.mrf.mxu0  ;;  %2030 = vmatmul.mubr.bf16.gmra.mxu1 %v727_v43 }
 0x172   : > { %v2004_v46 = vpop.f32.mrf.mxu0 }
 0x173   : > { %v729_v49 = vpack.c.bf16 %v2004_v46, %v2003_v44 }
 0x174   : > { %v696_v47 = vpop.f32.mrf.mxu0 }
 0x175   : > { %v728_v48 = vpack.c.bf16 %v696_v47, %v693_v45 }
 0x176   : > { %v2007_v50 = vpop.f32.mrf.mxu0 }
 0x177   : > { %2033 = vmatprep.mubr.bf16.mxu1 %v728_v48 }
 0x178   : > { %v709_v51 = vpop.f32.mrf.mxu0  ;;  %2034 = vmatmul.mubr.bf16.gmra.mxu1 %v729_v49 }
 0x17a   : > { %v2008_v52 = vpop.f32.mrf.mxu0 }
 0x17b   : > { %v731_v53 = vpack.c.bf16 %v2008_v52, %v2007_v50 }
 0x17c   : > { %v712_v54 = vpop.f32.mrf.mxu0 }
 0x17d   : > { %v730_v55 = vpack.c.bf16 %v712_v54, %v709_v51 }
 0x17f   : > { %2037 = vmatprep.mubr.bf16.mxu1 %v730_v55 }
 0x180   : > { %2038 = vmatmul.mubr.bf16.gmra.mxu1 %v731_v53 }
 0x228   : > { %v2027_v59 = vpop.f32.mrf.mxu1 }
 0x229   : > { %v2758_v60 = vadd.f32 %v2027_v59, %v2755_v58 }
 0x22a   : > { %v839_v61 = vpop.f32.mrf.mxu1 }
 0x22b   : > { %1261 = vst [vmem:[%s3264_s8 + $0x10] sm:$0xff] %v2758_v60  ;;  %v2767_v0 = vadd.f32 %v2755_v58, %v839_v61  ;;  %v909_v1 = vmax.f32 %v2758_v60, 0.0 }
 0x22c   : > { %v2028_v2 = vpop.f32.mrf.mxu1 }
 0x22d   : > { %v907_v3 = vmax.f32 %v2767_v0, 0.0  ;;  %1259 = vst [vmem:[%s3264_s8] sm:$0xff] %v2767_v0  ;;  %v2776_v4 = vadd.f32 %v2028_v2, %v2755_v58  ;;  %v925_v5 = vmul.f32 %v2760_v63, %v909_v1 }
 0x22e   : > { %v842_v6 = vpop.f32.mrf.mxu1 }
 0x22f   : > { %1262 = vst [vmem:[%s3264_s8 + $0x18] sm:$0xff] %v2776_v4  ;;  %v2786_v7 = vadd.f32 %v2755_v58, %v842_v6  ;;  %943 = vadd.xlane.f32.xlu0 %v925_v5  ;;  %v910_v8 = vmax.f32 %v2776_v4, 0.0  ;;  %v923_v13 = vmul.f32 %v2760_v63, %v907_v3 }
 0x230   : > { %v2031_v9 = vpop.f32.mrf.mxu1 }
 0x231   : > { %v908_v10 = vmax.f32 %v2786_v7, 0.0  ;;  %1260 = vst [vmem:[%s3264_s8 + $0x8] sm:$0xff] %v2786_v7  ;;  %v2795_v11 = vadd.f32 %v2031_v9, %v2755_v58  ;;  %v926_v12 = vmul.f32 %v2760_v63, %v910_v8 }
 0x232   : > { %v855_v14 = vpop.f32.mrf.mxu1 }
 0x233   : > { %1265 = vst [vmem:[%s3264_s8 + $0x30] sm:$0xff] %v2795_v11  ;;  %v2808_v15 = vadd.f32 %v2755_v58, %v855_v14  ;;  %945 = vadd.xlane.f32.xlu1 %v926_v12  ;;  %939 = vadd.xlane.f32.xlu0 %v923_v13  ;;  %v913_v17 = vmax.f32 %v2795_v11, 0.0  ;;  %v924_v19 = vmul.f32 %v2760_v63, %v908_v10 }
 0x234   : > { %v2032_v16 = vpop.f32.mrf.mxu1 }
 0x235   : > { %1263 = vst [vmem:[%s3264_s8 + $0x20] sm:$0xff] %v2808_v15  ;;  %v2816_v18 = vadd.f32 %v2032_v16, %v2755_v58  ;;  %v911_v23 = vmax.f32 %v2808_v15, 0.0  ;;  %v929_v26 = vmul.f32 %v2760_v63, %v913_v17 }
 0x236   : > { %v858_v20 = vpop.f32.mrf.mxu1 }
 0x237   : > { %1266 = vst [vmem:[%s3264_s8 + $0x38] sm:$0xff] %v2816_v18  ;;  %v2826_v21 = vadd.f32 %v2755_v58, %v858_v20  ;;  %941 = vadd.xlane.f32.xlu0 %v924_v19  ;;  %v927_v34 = vmul.f32 %v2760_v63, %v911_v23  ;;  %v914_v49 = vmax.f32 %v2816_v18, 0.0 }
 0x238   : > { %v2035_v22 = vpop.f32.mrf.mxu1 }
 0x239   : > { %v912_v24 = vmax.f32 %v2826_v21, 0.0  ;;  %1264 = vst [vmem:[%s3264_s8 + $0x28] sm:$0xff] %v2826_v21  ;;  %v2835_v25 = vadd.f32 %v2035_v22, %v2755_v58  ;;  %v930_v56 = vmul.f32 %v2760_v63, %v914_v49 }
 0x23a   : > { %v871_v27 = vpop.f32.mrf.mxu1 }
 0x23b   : > { %1269 = vst [vmem:[%s3264_s8 + $0x50] sm:$0xff] %v2835_v25  ;;  %v2845_v28 = vadd.f32 %v2755_v58, %v871_v27  ;;  %951 = vadd.xlane.f32.xlu0 %v929_v26  ;;  %v928_v29 = vmul.f32 %v2760_v63, %v912_v24  ;;  %v917_v31 = vmax.f32 %v2835_v25, 0.0 }
 0x23c   : > { %v2036_v30 = vpop.f32.mrf.mxu1 }
 0x23d   : > { %v915_v32 = vmax.f32 %v2845_v28, 0.0  ;;  %1267 = vst [vmem:[%s3264_s8 + $0x40] sm:$0xff] %v2845_v28  ;;  %v2857_v33 = vadd.f32 %v2036_v30, %v2755_v58  ;;  %949 = vadd.xlane.f32.xlu1 %v928_v29  ;;  %v933_v41 = vmul.f32 %v2760_v63, %v917_v31 }
 0x23e   : > { %v874_v35 = vpop.f32.mrf.mxu1 }
 0x23f   : > { %v918_v36 = vmax.f32 %v2857_v33, 0.0  ;;  %1270 = vst [vmem:[%s3264_s8 + $0x58] sm:$0xff] %v2857_v33  ;;  %v2868_v37 = vadd.f32 %v2755_v58, %v874_v35  ;;  %947 = vadd.xlane.f32.xlu0 %v927_v34  ;;  %v931_v38 = vmul.f32 %v2760_v63, %v915_v32 }
 0x240   : > { %v2039_v39 = vpop.f32.mrf.mxu1 }
 0x241   : > { %1268 = vst [vmem:[%s3264_s8 + $0x48] sm:$0xff] %v2868_v37  ;;  %v2878_v40 = vadd.f32 %v2039_v39, %v2755_v58  ;;  %955 = vadd.xlane.f32.xlu1 %v931_v38  ;;  %v916_v43 = vmax.f32 %v2868_v37, 0.0  ;;  %v934_v45 = vmul.f32 %v2760_v63, %v918_v36 }
 0x242   : > { %v887_v42 = vpop.f32.mrf.mxu1 }
 0x243   : > { %1273 = vst [vmem:[%s3264_s8 + $0x70] sm:$0xff] %v2878_v40  ;;  %v2889_v44 = vadd.f32 %v2755_v58, %v887_v42  ;;  %959 = vadd.xlane.f32.xlu0 %v933_v41  ;;  %v921_v51 = vmax.f32 %v2878_v40, 0.0  ;;  %v932_v53 = vmul.f32 %v2760_v63, %v916_v43 }
 0x244   : > { %v2040_v46 = vpop.f32.mrf.mxu1 }
 0x245   : > { %v919_v47 = vmax.f32 %v2889_v44, 0.0  ;;  %1271 = vst [vmem:[%s3264_s8 + $0x60] sm:$0xff] %v2889_v44  ;;  %v2900_v48 = vadd.f32 %v2040_v46, %v2755_v58  ;;  %961 = vadd.xlane.f32.xlu1 %v934_v45  ;;  %v937_v57 = vmul.f32 %v2760_v63, %v921_v51  ;;  %v2211_v46 = vld [vmem:[#allocation13 + $0x38] sm:$0xff]  }
 0x246   : > { %v890_v50 = vpop.f32.mrf.mxu1  ;;  %2041 = vmatprep.subr.bf16.mxu0 %v2211_v46  ;;  %2073 = vmatprep.subr.bf16.mxu1 %v2211_v46 }
 0x247   : > { %1274 = vst [vmem:[%s3264_s8 + $0x78] sm:$0xff] %v2900_v48  ;;  %v2909_v52 = vadd.f32 %v2755_v58, %v890_v50  ;;  %v935_v54 = vmul.f32 %v2760_v63, %v919_v47  ;;  %v922_v58 = vmax.f32 %v2900_v48, 0.0  ;;  %2042 = vmatpush3.bf16.msra.mxu0 %v2211_v46  ;;  %2081 = vmatpush3.bf16.msra.mxu1 %v2211_v46  ;;  %v2217_v48 = vld [vmem:[#allocation13 + $0x8] sm:$0xff]  }
 0x249   : > { %1272 = vst [vmem:[%s3264_s8 + $0x68] sm:$0xff] %v2909_v52  ;;  %957 = vadd.xlane.f32.xlu1 %v932_v53  ;;  %963 = vadd.xlane.f32.xlu0 %v935_v54  ;;  %v920_v55 = vmax.f32 %v2909_v52, 0.0  ;;  %v938_v61 = vmul.f32 %v2760_v63, %v922_v58 }
 0x24b   : > { %v936_v59 = vmul.f32 %v2760_v63, %v920_v55 }
 0x24d   : > { %953 = vadd.xlane.f32.xlu1 %v930_v56  ;;  %967 = vadd.xlane.f32.xlu0 %v937_v57 }
 0x251   : > { %965 = vadd.xlane.f32.xlu1 %v936_v59 }
 0x255   : > { %969 = vadd.xlane.f32.xlu1 %v938_v61 }
 0x2b8   : > { %v944_v62 = vpop.xlane.xlu0 %943 }
 0x2b9   : > { %v973_v2 = vmul.f32 0.03125, %v944_v62 }
 0x2bb   : > { %v2937_v5 = vsub.f32 %v909_v1, %v973_v2 }
 0x2bc   : > { %v946_v6 = vpop.xlane.xlu1 %945  ;;  %v940_v9 = vpop.xlane.xlu0 %939 }
 0x2bd   : > { %v974_v12 = vmul.f32 0.03125, %v946_v6  ;;  %v971_v13 = vmul.f32 0.03125, %v940_v9  ;;  %v1005_v14 = vmul.f32 %v2937_v5, %v2937_v5  ;;  %v2213_v9 = vld [vmem:[#allocation13 + $0x28] sm:$0xff]  }
 0x2bf   : > { %v2943_v16 = vsub.f32 %v910_v8, %v974_v12  ;;  %v2947_v19 = vsub.f32 %v907_v3, %v971_v13  ;;  %v1021_v20 = vmul.f32 %v2760_v63, %v1005_v14 }
 0x2c0   : > { %v942_v60 = vpop.xlane.xlu0 %941 }
 0x2c1   : > { %v972_v1 = vmul.f32 0.03125, %v942_v60  ;;  %1039 = vadd.xlane.f32.xlu0 %v1021_v20  ;;  %v1006_v22 = vmul.f32 %v2943_v16, %v2943_v16  ;;  %v1003_v26 = vmul.f32 %v2947_v19, %v2947_v19 }
 0x2c3   : > { %v2956_v4 = vsub.f32 %v908_v10, %v972_v1  ;;  %v1022_v8 = vmul.f32 %v2760_v63, %v1006_v22  ;;  %v1019_v0 = vmul.f32 %v2760_v63, %v1003_v26 }
 0x2c4   : > { %v952_v3 = vpop.xlane.xlu0 %951 }
 0x2c5   : > { %1041 = vadd.xlane.f32.xlu1 %v1022_v8  ;;  %1035 = vadd.xlane.f32.xlu0 %v1019_v0  ;;  %v1004_v27 = vmul.f32 %v2956_v4, %v2956_v4  ;;  %v2214_v8 = vld [vmem:[#allocation13 + $0x20] sm:$0xff]  }
 0x2c6   : > { %v950_v29 = vpop.xlane.xlu1 %949 }
 0x2c7   : > { %v976_v30 = vmul.f32 0.03125, %v950_v29  ;;  %v1020_v34 = vmul.f32 %v2760_v63, %v1004_v27 }
 0x2c8   : > { %v948_v35 = vpop.xlane.xlu0 %947 }
 0x2c9   : > { %v2965_v7 = vsub.f32 %v912_v24, %v976_v30  ;;  %v975_v10 = vmul.f32 0.03125, %v948_v35  ;;  %1037 = vadd.xlane.f32.xlu1 %v1020_v34  ;;  %v977_v24 = vmul.f32 0.03125, %v952_v3 }
 0x2ca   : > { %v956_v38 = vpop.xlane.xlu1 %955 }
 0x2cb   : > { %v2969_v39 = vsub.f32 %v911_v23, %v975_v10  ;;  %v979_v41 = vmul.f32 0.03125, %v956_v38  ;;  %v1008_v42 = vmul.f32 %v2965_v7, %v2965_v7  ;;  %v2993_v25 = vsub.f32 %v913_v17, %v977_v24  ;;  %v2216_v38 = vld [vmem:[#allocation13 + $0x10] sm:$0xff]  }
 0x2cc   : > { %v960_v45 = vpop.xlane.xlu0 %959 }
 0x2cd   : > { %v981_v50 = vmul.f32 0.03125, %v960_v45  ;;  %v1024_v53 = vmul.f32 %v2760_v63, %v1008_v42  ;;  %v1007_v21 = vmul.f32 %v2969_v39, %v2969_v39  ;;  %v2978_v54 = vsub.f32 %v915_v32, %v979_v41  ;;  %v2212_v32 = vld [vmem:[#allocation13 + $0x30] sm:$0xff]  }
 0x2ce   : > { %v962_v15 = vpop.xlane.xlu1 %961  ;;  %2043 = vmatprep.subr.bf16.mxu0 %v2212_v32  ;;  %2074 = vmatprep.subr.bf16.mxu1 %v2212_v32  ;;  %v1009_v20 = vmul.f32 %v2993_v25, %v2993_v25 }
 0x2cf   : > { %v2982_v23 = vsub.f32 %v917_v31, %v981_v50  ;;  %v982_v56 = vmul.f32 0.03125, %v962_v15  ;;  %1045 = vadd.xlane.f32.xlu1 %v1024_v53  ;;  %v1023_v57 = vmul.f32 %v2760_v63, %v1007_v21  ;;  %v1011_v62 = vmul.f32 %v2978_v54, %v2978_v54  ;;  %2044 = vmatpush3.bf16.msra.mxu0 %v2212_v32 }
 0x2d0   : > { %2082 = vmatpush3.bf16.msra.mxu1 %v2212_v32  ;;  %2045 = vmatprep.subr.bf16.mxu0 %v2213_v9 }
 0x2d1   : > { %v2987_v59 = vsub.f32 %v918_v36, %v982_v56  ;;  %1043 = vadd.xlane.f32.xlu0 %v1023_v57  ;;  %v1013_v28 = vmul.f32 %v2982_v23, %v2982_v23  ;;  %v1027_v14 = vmul.f32 %v2760_v63, %v1011_v62  ;;  %2075 = vmatprep.subr.bf16.mxu1 %v2213_v9 }
 0x2d2   : > { %v958_v31 = vpop.xlane.xlu1 %957  ;;  %v964_v61 = vpop.xlane.xlu0 %963 }
 0x2d3   : > { %v980_v2 = vmul.f32 0.03125, %v958_v31  ;;  %v983_v6 = vmul.f32 0.03125, %v964_v61  ;;  %v1029_v33 = vmul.f32 %v2760_v63, %v1013_v28  ;;  %v1014_v36 = vmul.f32 %v2987_v59, %v2987_v59  ;;  %2046 = vmatpush3.bf16.msra.mxu0 %v2213_v9 }
 0x2d4   : > { %2083 = vmatpush3.bf16.msra.mxu1 %v2213_v9  ;;  %2047 = vmatprep.subr.bf16.mxu0 %v2214_v8 }
 0x2d5   : > { %v3002_v11 = vsub.f32 %v916_v43, %v980_v2  ;;  %1055 = vadd.xlane.f32.xlu0 %v1029_v33  ;;  %v1030_v17 = vmul.f32 %v2760_v63, %v1014_v36  ;;  %v3010_v60 = vsub.f32 %v919_v47, %v983_v6  ;;  %v1025_v47 = vmul.f32 %v2760_v63, %v1009_v20 }
 0x2d6   : > { %v954_v12 = vpop.xlane.xlu1 %953  ;;  %v968_v13 = vpop.xlane.xlu0 %967  ;;  %2076 = vmatprep.subr.bf16.mxu1 %v2214_v8 }
 0x2d7   : > { %v978_v1 = vmul.f32 0.03125, %v954_v12  ;;  %v985_v22 = vmul.f32 0.03125, %v968_v13  ;;  %1057 = vadd.xlane.f32.xlu1 %v1030_v17  ;;  %v1012_v37 = vmul.f32 %v3002_v11, %v3002_v11  ;;  %v1015_v18 = vmul.f32 %v3010_v60, %v3010_v60  ;;  %2048 = vmatpush3.bf16.msra.mxu0 %v2214_v8 }
 0x2d8   : > { %2084 = vmatpush3.bf16.msra.mxu1 %v2214_v8 }
 0x2d9   : > { %v3016_v43 = vsub.f32 %v914_v49, %v978_v1  ;;  %1051 = vadd.xlane.f32.xlu0 %v1027_v14  ;;  %v1028_v26 = vmul.f32 %v2760_v63, %v1012_v37  ;;  %v3022_v0 = vsub.f32 %v921_v51, %v985_v22  ;;  %v2215_v51 = vld [vmem:[#allocation13 + $0x18] sm:$0xff]   ;;  %v1031_v34 = vmul.f32 %v2760_v63, %v1015_v18  ;;  %v3050_v14 = vld [vmem:[%s1131_s28] ss:$0 sm:$0xff] }
 0x2da   : > { %v966_v44 = vpop.xlane.xlu1 %965  ;;  %2049 = vmatprep.subr.bf16.mxu0 %v2215_v51  ;;  %2077 = vmatprep.subr.bf16.mxu1 %v2215_v51  ;;  %v3056_v18 = vld [vmem:[%s1153_s29] ss:$0 sm:$0xff] }
 0x2db   : > { %v984_v3 = vmul.f32 0.03125, %v966_v44  ;;  %1053 = vadd.xlane.f32.xlu1 %v1028_v26  ;;  %v1010_v27 = vmul.f32 %v3016_v43, %v3016_v43  ;;  %v1017_v10 = vmul.f32 %v3022_v0, %v3022_v0  ;;  %2050 = vmatpush3.bf16.msra.mxu0 %v2215_v51 }
 0x2dc   : > { %2085 = vmatpush3.bf16.msra.mxu1 %v2215_v51  ;;  %2051 = vmatprep.subr.bf16.mxu0 %v2216_v38 }
 0x2dd   : > { %v3030_v49 = vsub.f32 %v920_v55, %v984_v3  ;;  %1047 = vadd.xlane.f32.xlu0 %v1025_v47  ;;  %v1026_v40 = vmul.f32 %v2760_v63, %v1010_v27  ;;  %v1033_v41 = vmul.f32 %v2760_v63, %v1017_v10  ;;  %2078 = vmatprep.subr.bf16.mxu1 %v2216_v38 }
 0x2de   : > { %v970_v29 = vpop.xlane.xlu1 %969 }
 0x2df   : > { %v986_v30 = vmul.f32 0.03125, %v970_v29  ;;  %1049 = vadd.xlane.f32.xlu1 %v1026_v40  ;;  %v1016_v35 = vmul.f32 %v3030_v49, %v3030_v49  ;;  %2052 = vmatpush3.bf16.msra.mxu0 %v2216_v38 }
 0x2e0   : > { %2086 = vmatpush3.bf16.msra.mxu1 %v2216_v38  ;;  %2053 = vmatprep.subr.bf16.mxu0 %v2217_v48 }
 0x2e1   : > { %v3040_v52 = vsub.f32 %v922_v58, %v986_v30  ;;  %1059 = vadd.xlane.f32.xlu0 %v1031_v34  ;;  %v1032_v55 = vmul.f32 %v2760_v63, %v1016_v35  ;;  %2079 = vmatprep.subr.bf16.mxu1 %v2217_v48  ;;  %v2218_v58 = vld [vmem:[#allocation13] sm:$0xff]  }
 0x2e3   : > { %1061 = vadd.xlane.f32.xlu1 %v1032_v55  ;;  %v1018_v42 = vmul.f32 %v3040_v52, %v3040_v52  ;;  %2054 = vmatpush3.bf16.msra.mxu0 %v2217_v48 }
 0x2e4   : > { %2087 = vmatpush3.bf16.msra.mxu1 %v2217_v48  ;;  %2055 = vmatprep.subr.bf16.mxu0 %v2218_v58 }
 0x2e5   : > { %1063 = vadd.xlane.f32.xlu0 %v1033_v41  ;;  %v1034_v45 = vmul.f32 %v2760_v63, %v1018_v42  ;;  %2080 = vmatprep.subr.bf16.mxu1 %v2218_v58 }
 0x2e7   : > { %1065 = vadd.xlane.f32.xlu1 %v1034_v45  ;;  %2056 = vmatpush3.bf16.msra.mxu0 %v2218_v58 }
 0x2e8   : > { %2088 = vmatpush3.bf16.msra.mxu1 %v2218_v58 }
 0x34a   : > { %v1040_v46 = vpop.xlane.xlu0 %1039 }
 0x34b   : > { %v1069_v50 = vmul.f32 0.03125, %v1040_v46 }
 0x34d   : > { %v1085_v53 = vadd.f32 1e-05, %v1069_v50 }
 0x34e   : > { %v1042_v21 = vpop.xlane.xlu1 %1041  ;;  %v1036_v24 = vpop.xlane.xlu0 %1035 }
 0x34f   : > { %2219 = vrsqrt.f32 %v1085_v53  ;;  %v1070_v63 = vmul.f32 0.03125, %v1042_v21  ;;  %v1067_v15 = vmul.f32 0.03125, %v1036_v24 }
 0x351   : > { %v1086_v56 = vadd.f32 1e-05, %v1070_v63  ;;  %v1083_v57 = vadd.f32 1e-05, %v1067_v15 }
 0x352   : > { %v1038_v28 = vpop.xlane.xlu1 %1037 }
 0x353   : > { %2221 = vrsqrt.f32 %v1086_v56  ;;  %v1068_v32 = vmul.f32 0.03125, %v1038_v28 }
 0x354   : > { %2223 = vrsqrt.f32 %v1083_v57 }
 0x355   : > { %v1084_v31 = vadd.f32 1e-05, %v1068_v32 }
 0x357   : > { %2225 = vrsqrt.f32 %v1084_v31 }
 0x358   : > { %v1046_v61 = vpop.xlane.xlu1 %1045 }
 0x359   : > { %v1072_v62 = vmul.f32 0.03125, %v1046_v61 }
 0x35a   : > { %v1044_v2 = vpop.xlane.xlu0 %1043 }
 0x35b   : > { %v1088_v6 = vadd.f32 1e-05, %v1072_v62  ;;  %v1071_v33 = vmul.f32 0.03125, %v1044_v2 }
 0x35c   : > { %v2220_v36 = vpop.eup %2219 }
 0x35d   : > { %2227 = vrsqrt.f32 %v1088_v6  ;;  %v1087_v17 = vadd.f32 1e-05, %v1071_v33  ;;  %v1117_v9 = vmul.f32 %v2220_v36, %v2937_v5 }
 0x35e   : > { %v1056_v12 = vpop.xlane.xlu0 %1055 }
 0x35f   : > { %2229 = vrsqrt.f32 %v1087_v17  ;;  %v1077_v13 = vmul.f32 0.03125, %v1056_v12  ;;  %v1139_v5 = vmul.f32 %v3050_v14, %v1117_v9 }
 0x360   : > { %v2222_v20 = vpop.eup %2221  ;;  %v1058_v1 = vpop.xlane.xlu1 %1057 }
 0x361   : > { %v2224_v22 = vpop.eup %2223  ;;  %v1118_v37 = vmul.f32 %v2222_v20, %v2943_v16  ;;  %v1093_v26 = vadd.f32 1e-05, %v1077_v13  ;;  %v1078_v8 = vmul.f32 0.03125, %v1058_v1  ;;  %v1161_v10 = vadd.f32 %v3056_v18, %v1139_v5 }
 0x362   : > { %v1052_v44 = vpop.xlane.xlu0 %1051  ;;  %v1115_v47 = vmul.f32 %v2224_v22, %v2947_v19 }
 0x363   : > { %2231 = vrsqrt.f32 %v1093_v26  ;;  %v1094_v3 = vadd.f32 1e-05, %v1078_v8  ;;  %v1075_v27 = vmul.f32 0.03125, %v1052_v44  ;;  %v1140_v40 = vmul.f32 %v3050_v14, %v1118_v37 }
 0x364   : > { %v2226_v51 = vpop.eup %2225  ;;  %v1054_v29 = vpop.xlane.xlu1 %1053  ;;  %v1137_v16 = vmul.f32 %v3050_v14, %v1115_v47 }
 0x365   : > { %2233 = vrsqrt.f32 %v1094_v3  ;;  %v1091_v30 = vadd.f32 1e-05, %v1075_v27  ;;  %v1076_v34 = vmul.f32 0.03125, %v1054_v29  ;;  %v1116_v19 = vmul.f32 %v2226_v51, %v2956_v4 }
 0x366   : > { %v1048_v35 = vpop.xlane.xlu0 %1047  ;;  %v1162_v55 = vadd.f32 %v3056_v18, %v1140_v40  ;;  %v1159_v48 = vadd.f32 %v3056_v18, %v1137_v16 }
 0x367   : > { %2235 = vrsqrt.f32 %v1091_v30  ;;  %v1092_v38 = vadd.f32 1e-05, %v1076_v34  ;;  %v1073_v41 = vmul.f32 0.03125, %v1048_v35  ;;  %v1138_v42 = vmul.f32 %v3050_v14, %v1116_v19 }
 0x368   : > { %v1050_v45 = vpop.xlane.xlu1 %1049  ;;  %v1176_v58 = vpack.c.bf16 %v1162_v55, %v1161_v10 }
 0x369   : > { %2237 = vrsqrt.f32 %v1092_v38  ;;  %v1089_v46 = vadd.f32 1e-05, %v1073_v41  ;;  %v1074_v50 = vmul.f32 0.03125, %v1050_v45  ;;  %v1160_v53 = vadd.f32 %v3056_v18, %v1138_v42 }
 0x36a   : > { %v2228_v4 = vpop.eup %2227  ;;  %v1060_v21 = vpop.xlane.xlu0 %1059  ;;  %1922 = vst [vmem:[%s3066_s30 + $0x8] sm:$0xff] %v1176_v58  }
 0x36b   : > { %2239 = vrsqrt.f32 %v1089_v46  ;;  %v1090_v24 = vadd.f32 1e-05, %v1074_v50  ;;  %v1079_v63 = vmul.f32 0.03125, %v1060_v21  ;;  %v1175_v15 = vpack.c.bf16 %v1160_v53, %v1159_v48 }
 0x36c   : > { %v2230_v56 = vpop.eup %2229  ;;  %v1062_v57 = vpop.xlane.xlu1 %1061  ;;  %v1120_v28 = vmul.f32 %v2228_v4, %v2965_v7 }
 0x36d   : > { %2241 = vrsqrt.f32 %v1090_v24  ;;  %v1095_v32 = vadd.f32 1e-05, %v1079_v63  ;;  %v1080_v31 = vmul.f32 0.03125, %v1062_v57  ;;  %1886 = vst [vmem:[%s3066_s30] sm:$0xff] %v1175_v15   ;;  %2057 = vmatprep.mubr.bf16.mxu0 %v1175_v15  ;;  %v1119_v61 = vmul.f32 %v2230_v56, %v2969_v39 }
 0x36e   : > { %2058 = vmatmul.mubr.bf16.vlgmr.msra.gmra.mxu0 %v1176_v58  ;;  %v1064_v62 = vpop.xlane.xlu0 %1063  ;;  %v1142_v2 = vmul.f32 %v3050_v14, %v1120_v28  ;;  %v1849_v28 = vld [vmem:[%s3263_s7] ss:$0 sm:$0xff] }
 0x36f   : > { %2243 = vrsqrt.f32 %v1095_v32  ;;  %v1096_v6 = vadd.f32 1e-05, %v1080_v31  ;;  %v1081_v33 = vmul.f32 0.03125, %v1064_v62  ;;  %v1141_v36 = vmul.f32 %v3050_v14, %v1119_v61 }
 0x370   : > { %v2232_v17 = vpop.eup %2231  ;;  %v1066_v9 = vpop.xlane.xlu1 %1065  ;;  %v1164_v1 = vadd.f32 %v3056_v18, %v1142_v2 }
 0x371   : > { %v1125_v7 = vmul.f32 %v2232_v17, %v2982_v23  ;;  %2245 = vrsqrt.f32 %v1096_v6  ;;  %v1097_v12 = vadd.f32 1e-05, %v1081_v33  ;;  %v1082_v13 = vmul.f32 0.03125, %v1066_v9 }
 0x372   : > { %v2234_v20 = vpop.eup %2233  ;;  %v1163_v39 = vadd.f32 %v3056_v18, %v1141_v36 }
 0x373   : > { %v1126_v22 = vmul.f32 %v2234_v20, %v2987_v59  ;;  %2247 = vrsqrt.f32 %v1097_v12  ;;  %v1098_v37 = vadd.f32 1e-05, %v1082_v13  ;;  %v1147_v26 = vmul.f32 %v3050_v14, %v1125_v7 }
 0x374   : > { %v2236_v8 = vpop.eup %2235  ;;  %v1177_v44 = vpack.c.bf16 %v1164_v1, %v1163_v39 }
 0x375   : > { %2249 = vrsqrt.f32 %v1098_v37  ;;  %v1123_v23 = vmul.f32 %v2236_v8, %v2978_v54  ;;  %v1148_v47 = vmul.f32 %v3050_v14, %v1126_v22  ;;  %v1169_v59 = vadd.f32 %v3056_v18, %v1147_v26 }
 0x376   : > { %v2238_v5 = vpop.eup %2237  ;;  %1923 = vst [vmem:[%s3066_s30 + $0x10] sm:$0xff] %v1177_v44   ;;  %2061 = vmatprep.mubr.bf16.mxu0 %v1177_v44 }
 0x377   : > { %v1124_v3 = vmul.f32 %v2238_v5, %v3002_v11  ;;  %v1145_v27 = vmul.f32 %v3050_v14, %v1123_v23  ;;  %v1170_v40 = vadd.f32 %v3056_v18, %v1148_v47 }
 0x378   : > { %v2240_v51 = vpop.eup %2239 }
 0x379   : > { %v1146_v29 = vmul.f32 %v3050_v14, %v1124_v3  ;;  %v1180_v16 = vpack.c.bf16 %v1170_v40, %v1169_v59  ;;  %v1121_v54 = vmul.f32 %v2240_v51, %v2993_v25  ;;  %v1167_v34 = vadd.f32 %v3056_v18, %v1145_v27 }
 0x37a   : > { %v2242_v30 = vpop.eup %2241 }
 0x37b   : > { %v1168_v19 = vadd.f32 %v3056_v18, %v1146_v29  ;;  %1926 = vst [vmem:[%s3066_s30 + $0x28] sm:$0xff] %v1180_v16   ;;  %v1122_v11 = vmul.f32 %v2242_v30, %v3016_v43  ;;  %v1143_v35 = vmul.f32 %v3050_v14, %v1121_v54 }
 0x37c   : > { %v2244_v10 = vpop.eup %2243 }
 0x37d   : > { %v1179_v55 = vpack.c.bf16 %v1168_v19, %v1167_v34  ;;  %v1144_v38 = vmul.f32 %v3050_v14, %v1122_v11  ;;  %v1127_v41 = vmul.f32 %v2244_v10, %v3010_v60  ;;  %v1165_v25 = vadd.f32 %v3056_v18, %v1143_v35 }
 0x37e   : > { %v2246_v42 = vpop.eup %2245 }
 0x37f   : > { %1925 = vst [vmem:[%s3066_s30 + $0x20] sm:$0xff] %v1179_v55   ;;  %2065 = vmatprep.mubr.bf16.mxu1 %v1179_v55  ;;  %v1166_v45 = vadd.f32 %v3056_v18, %v1144_v38  ;;  %v1128_v48 = vmul.f32 %v2246_v42, %v3030_v49  ;;  %v1149_v43 = vmul.f32 %v3050_v14, %v1127_v41 }
 0x380   : > { %v2248_v58 = vpop.eup %2247  ;;  %2066 = vmatmul.mubr.bf16.vlgmr.msra.gmra.mxu1 %v1180_v16 }
 0x381   : > { %v1178_v46 = vpack.c.bf16 %v1166_v45, %v1165_v25  ;;  %v1150_v50 = vmul.f32 %v3050_v14, %v1128_v48  ;;  %v1129_v60 = vmul.f32 %v2248_v58, %v3022_v0  ;;  %v1171_v4 = vadd.f32 %v3056_v18, %v1149_v43 }
 0x382   : > { %v2250_v53 = vpop.eup %2249 }
 0x383   : > { %1924 = vst [vmem:[%s3066_s30 + $0x18] sm:$0xff] %v1178_v46   ;;  %2062 = vmatmul.mubr.bf16.gmra.mxu0 %v1178_v46  ;;  %v1172_v21 = vadd.f32 %v3056_v18, %v1150_v50  ;;  %v1130_v49 = vmul.f32 %v2250_v53, %v3040_v52  ;;  %v1151_v24 = vmul.f32 %v3050_v14, %v1129_v60 }
 0x385   : > { %v1181_v63 = vpack.c.bf16 %v1172_v21, %v1171_v4  ;;  %v1152_v15 = vmul.f32 %v3050_v14, %v1130_v49  ;;  %v1173_v56 = vadd.f32 %v3056_v18, %v1151_v24 }
 0x387   : > { %1927 = vst [vmem:[%s3066_s30 + $0x30] sm:$0xff] %v1181_v63   ;;  %2069 = vmatprep.mubr.bf16.mxu1 %v1181_v63  ;;  %v1174_v0 = vadd.f32 %v3056_v18, %v1152_v15 }
 0x389   : > { %v1182_v57 = vpack.c.bf16 %v1174_v0, %v1173_v56 }
 0x38b   : > { %1928 = vst [vmem:[%s3066_s30 + $0x38] sm:$0xff] %v1182_v57   ;;  %2070 = vmatmul.mubr.bf16.gmra.mxu1 %v1182_v57 }
 0x42e   : > { %v2059_v32 = vpop.f32.mrf.mxu0 }
 0x42f   : > { %v1389_v52 = vadd.f32 %v2059_v32, %v1849_v28 }
 0x430   : > { %v1380_v31 = vpop.f32.mrf.mxu0 }
 0x431   : > { %1447 = vmax.xlane.f32.xlu0 %v1389_v52  ;;  %v1381_v62 = vadd.f32 %v1849_v28, %v1380_v31 }
 0x432   : > { %v2060_v61 = vpop.f32.mrf.mxu0 }
 0x433   : > { %v1392_v14 = vadd.f32 %v2060_v61, %v1849_v28 }
 0x434   : > { %v1383_v2 = vpop.f32.mrf.mxu0 }
 0x435   : > { %1449 = vmax.xlane.f32.xlu1 %v1392_v14  ;;  %1443 = vmax.xlane.f32.xlu0 %v1381_v62  ;;  %v1384_v6 = vadd.f32 %v1849_v28, %v1383_v2 }
 0x439   : > { %1445 = vmax.xlane.f32.xlu1 %v1384_v6 }
 0x440   : > { %v2067_v18 = vpop.f32.mrf.mxu1 }
 0x441   : > { %v1421_v37 = vadd.f32 %v2067_v18, %v1849_v28 }
 0x442   : > { %v1412_v33 = vpop.f32.mrf.mxu1 }
 0x443   : > { %v2063_v36 = vpop.f32.mrf.mxu0  ;;  %v1413_v44 = vadd.f32 %v1849_v28, %v1412_v33 }
 0x444   : > { %v1405_v17 = vadd.f32 %v2063_v36, %v1849_v28  ;;  %v2068_v9 = vpop.f32.mrf.mxu1 }
 0x445   : > { %v1396_v7 = vpop.f32.mrf.mxu0  ;;  %v1424_v23 = vadd.f32 %v2068_v9, %v1849_v28 }
 0x446   : > { %1455 = vmax.xlane.f32.xlu0 %v1405_v17  ;;  %v1397_v13 = vadd.f32 %v1849_v28, %v1396_v7  ;;  %v1415_v39 = vpop.f32.mrf.mxu1 }
 0x447   : > { %v2064_v12 = vpop.f32.mrf.mxu0  ;;  %v3115_v5 = vadd.f32 %v1849_v28, %v1415_v39 }
 0x448   : > { %v1408_v20 = vadd.f32 %v2064_v12, %v1849_v28 }
 0x449   : > { %v1399_v1 = vpop.f32.mrf.mxu0 }
 0x44a   : > { %1457 = vmax.xlane.f32.xlu1 %v1408_v20  ;;  %1451 = vmax.xlane.f32.xlu0 %v1397_v13  ;;  %v1400_v26 = vadd.f32 %v1849_v28, %v1399_v1 }
 0x44b   : > { %v2071_v22 = vpop.f32.mrf.mxu1 }
 0x44c   : > { %v3121_v59 = vadd.f32 %v2071_v22, %v1849_v28 }
 0x44d   : > { %v1428_v8 = vpop.f32.mrf.mxu1 }
 0x44e   : > { %1453 = vmax.xlane.f32.xlu1 %v1400_v26  ;;  %1463 = vmax.xlane.f32.xlu0 %v1421_v37  ;;  %v3117_v3 = vadd.f32 %v1849_v28, %v1428_v8 }
 0x44f   : > { %v2072_v47 = vpop.f32.mrf.mxu1 }
 0x450   : > { %v3127_v51 = vadd.f32 %v2072_v47, %v1849_v28 }
 0x451   : > { %v1431_v27 = vpop.f32.mrf.mxu1 }
 0x452   : > { %1465 = vmax.xlane.f32.xlu1 %v1424_v23  ;;  %1459 = vmax.xlane.f32.xlu0 %v1413_v44  ;;  %v3123_v40 = vadd.f32 %v1849_v28, %v1431_v27 }
 0x456   : > { %1461 = vmax.xlane.f32.xlu1 %v3115_v5  ;;  %1467 = vmax.xlane.f32.xlu0 %v3117_v3 }
 0x45a   : > { %1469 = vmax.xlane.f32.xlu1 %v3123_v40  ;;  %1471 = vmax.xlane.f32.xlu0 %v3121_v59 }
 0x45e   : > { %1473 = vmax.xlane.f32.xlu1 %v3127_v51 }
 0x4ba   : > { %v1448_v29 = vpop.xlane.xlu0 %1447 }
 0x4bb   : > { %v3130_v16 = vsub.f32 %v1389_v52, %v1448_v29 }
 0x4bd   : > { %v1495_v54 = vmul.f32 1.442695, %v3130_v16 }
 0x4be   : > { %v1450_v30 = vpop.xlane.xlu1 %1449  ;;  %v1444_v34 = vpop.xlane.xlu0 %1443 }
 0x4bf   : > { %2251 = vpow2.f32 %v1495_v54  ;;  %v3133_v19 = vsub.f32 %v1392_v14, %v1450_v30  ;;  %v3135_v11 = vsub.f32 %v1381_v62, %v1444_v34 }
 0x4c1   : > { %v1497_v35 = vmul.f32 1.442695, %v3133_v19  ;;  %v1491_v10 = vmul.f32 1.442695, %v3135_v11 }
 0x4c2   : > { %v1446_v55 = vpop.xlane.xlu1 %1445 }
 0x4c3   : > { %2253 = vpow2.f32 %v1497_v35  ;;  %v3139_v38 = vsub.f32 %v1384_v6, %v1446_v55 }
 0x4c4   : > { %2255 = vpow2.f32 %v1491_v10 }
 0x4c5   : > { %v1493_v41 = vmul.f32 1.442695, %v3139_v38 }
 0x4c7   : > { %2257 = vpow2.f32 %v1493_v41 }
 0x4cc   : > { %v2252_v42 = vpop.eup %2251 }
 0x4cd   : > { %1527 = vadd.xlane.f32.xlu0 %v2252_v42 }
 0x4cf   : > { %v1456_v25 = vpop.xlane.xlu0 %1455 }
 0x4d0   : > { %v2254_v45 = vpop.eup %2253  ;;  %v3142_v48 = vsub.f32 %v1405_v17, %v1456_v25 }
 0x4d1   : > { %v2256_v43 = vpop.eup %2255  ;;  %1529 = vadd.xlane.f32.xlu1 %v2254_v45 }
 0x4d2   : > { %v1503_v58 = vmul.f32 1.442695, %v3142_v48  ;;  %1523 = vadd.xlane.f32.xlu0 %v2256_v43 }
 0x4d3   : > { %v1458_v46 = vpop.xlane.xlu1 %1457  ;;  %v1452_v50 = vpop.xlane.xlu0 %1451 }
 0x4d4   : > { %v2258_v60 = vpop.eup %2257  ;;  %2259 = vpow2.f32 %v1503_v58  ;;  %v3145_v53 = vsub.f32 %v1408_v20, %v1458_v46  ;;  %v3147_v4 = vsub.f32 %v1397_v13, %v1452_v50 }
 0x4d5   : > { %1525 = vadd.xlane.f32.xlu1 %v2258_v60 }
 0x4d6   : > { %v1505_v21 = vmul.f32 1.442695, %v3145_v53  ;;  %v1499_v49 = vmul.f32 1.442695, %v3147_v4 }
 0x4d7   : > { %v1454_v24 = vpop.xlane.xlu1 %1453  ;;  %v1464_v63 = vpop.xlane.xlu0 %1463 }
 0x4d8   : > { %2261 = vpow2.f32 %v1505_v21  ;;  %v3151_v15 = vsub.f32 %v1400_v26, %v1454_v24  ;;  %v3153_v56 = vsub.f32 %v1421_v37, %v1464_v63 }
 0x4d9   : > { %2263 = vpow2.f32 %v1499_v49 }
 0x4da   : > { %v1501_v0 = vmul.f32 1.442695, %v3151_v15  ;;  %v1511_v57 = vmul.f32 1.442695, %v3153_v56 }
 0x4db   : > { %v1466_v28 = vpop.xlane.xlu1 %1465  ;;  %v1460_v32 = vpop.xlane.xlu0 %1459 }
 0x4dc   : > { %2265 = vpow2.f32 %v1501_v0  ;;  %v3157_v52 = vsub.f32 %v1424_v23, %v1466_v28  ;;  %v3159_v31 = vsub.f32 %v1413_v44, %v1460_v32 }
 0x4dd   : > { %2267 = vpow2.f32 %v1511_v57 }
 0x4de   : > { %v1513_v61 = vmul.f32 1.442695, %v3157_v52  ;;  %v1507_v62 = vmul.f32 1.442695, %v3159_v31 }
 0x4df   : > { %v1462_v14 = vpop.xlane.xlu1 %1461  ;;  %v1468_v2 = vpop.xlane.xlu0 %1467 }
 0x4e0   : > { %2269 = vpow2.f32 %v1513_v61  ;;  %v3164_v6 = vsub.f32 %v3115_v5, %v1462_v14  ;;  %v3167_v18 = vsub.f32 %v3117_v3, %v1468_v2 }
 0x4e1   : > { %v2260_v33 = vpop.eup %2259  ;;  %2271 = vpow2.f32 %v1507_v62 }
 0x4e2   : > { %v1509_v36 = vmul.f32 1.442695, %v3164_v6  ;;  %v1515_v17 = vmul.f32 1.442695, %v3167_v18  ;;  %1535 = vadd.xlane.f32.xlu0 %v2260_v33 }
 0x4e3   : > { %v1470_v9 = vpop.xlane.xlu1 %1469  ;;  %v1472_v7 = vpop.xlane.xlu0 %1471 }
 0x4e4   : > { %2273 = vpow2.f32 %v1509_v36  ;;  %v3172_v12 = vsub.f32 %v3123_v40, %v1470_v9  ;;  %v3175_v13 = vsub.f32 %v3121_v59, %v1472_v7 }
 0x4e5   : > { %v2262_v20 = vpop.eup %2261  ;;  %2275 = vpow2.f32 %v1515_v17 }
 0x4e6   : > { %v2264_v39 = vpop.eup %2263  ;;  %v1517_v1 = vmul.f32 1.442695, %v3172_v12  ;;  %v1519_v22 = vmul.f32 1.442695, %v3175_v13  ;;  %1537 = vadd.xlane.f32.xlu1 %v2262_v20 }
 0x4e7   : > { %1531 = vadd.xlane.f32.xlu0 %v2264_v39  ;;  %v1474_v37 = vpop.xlane.xlu1 %1473 }
 0x4e8   : > { %2277 = vpow2.f32 %v1517_v1  ;;  %v3180_v26 = vsub.f32 %v3127_v51, %v1474_v37 }
 0x4e9   : > { %v2266_v8 = vpop.eup %2265  ;;  %2279 = vpow2.f32 %v1519_v22 }
 0x4ea   : > { %v2268_v44 = vpop.eup %2267  ;;  %v1521_v23 = vmul.f32 1.442695, %v3180_v26  ;;  %1533 = vadd.xlane.f32.xlu1 %v2266_v8 }
 0x4eb   : > { %1543 = vadd.xlane.f32.xlu0 %v2268_v44 }
 0x4ec   : > { %2281 = vpow2.f32 %v1521_v23 }
 0x4ed   : > { %v2270_v47 = vpop.eup %2269 }
 0x4ee   : > { %v2272_v5 = vpop.eup %2271  ;;  %1545 = vadd.xlane.f32.xlu1 %v2270_v47 }
 0x4ef   : > { %1539 = vadd.xlane.f32.xlu0 %v2272_v5 }
 0x4f1   : > { %v2274_v3 = vpop.eup %2273 }
 0x4f2   : > { %v2276_v27 = vpop.eup %2275  ;;  %1541 = vadd.xlane.f32.xlu1 %v2274_v3 }
 0x4f3   : > { %1547 = vadd.xlane.f32.xlu0 %v2276_v27 }
 0x4f5   : > { %v2278_v59 = vpop.eup %2277 }
 0x4f6   : > { %v2280_v40 = vpop.eup %2279  ;;  %1549 = vadd.xlane.f32.xlu1 %v2278_v59 }
 0x4f7   : > { %1551 = vadd.xlane.f32.xlu0 %v2280_v40 }
 0x4f9   : > { %v2282_v51 = vpop.eup %2281 }
 0x4fa   : > { %1553 = vadd.xlane.f32.xlu1 %v2282_v51 }
 0x556   : > { %v1528_v29 = vpop.xlane.xlu0 %1527 }
 0x557   : > { %2283 = vlog2.f32 %v1528_v29 }
 0x55a   : > { %v1530_v54 = vpop.xlane.xlu1 %1529 }
 0x55b   : > { %2285 = vlog2.f32 %v1530_v54  ;;  %v1524_v30 = vpop.xlane.xlu0 %1523 }
 0x55c   : > { %2287 = vlog2.f32 %v1524_v30 }
 0x55e   : > { %v1526_v34 = vpop.xlane.xlu1 %1525 }
 0x55f   : > { %2289 = vlog2.f32 %v1526_v34 }
 0x564   : > { %v2284_v35 = vpop.eup %2283 }
 0x565   : > { %v1560_v10 = vmul.f32 0.6931472, %v2284_v35 }
 0x567   : > { %v1589_v55 = vsub.f32 %v3130_v16, %v1560_v10 }
 0x568   : > { %v2286_v41 = vpop.eup %2285 }
 0x569   : > { %v2288_v42 = vpop.eup %2287  ;;  %1605 = vst [vmem:[%s3265_s9 + $0x10] sm:$0xff] %v1589_v55  ;;  %v1562_v25 = vmul.f32 0.6931472, %v2286_v41 }
 0x56a   : > { %v1556_v45 = vmul.f32 0.6931472, %v2288_v42 }
 0x56b   : > { %v1590_v43 = vsub.f32 %v3133_v19, %v1562_v25  ;;  %v1536_v58 = vpop.xlane.xlu0 %1535 }
 0x56c   : > { %v2290_v46 = vpop.eup %2289  ;;  %v1587_v50 = vsub.f32 %v3135_v11, %v1556_v45  ;;  %2291 = vlog2.f32 %v1536_v58 }
 0x56d   : > { %1606 = vst [vmem:[%s3265_s9 + $0x18] sm:$0xff] %v1590_v43  ;;  %v1558_v16 = vmul.f32 0.6931472, %v2290_v46 }
 0x56e   : > { %1603 = vst [vmem:[%s3265_s9] sm:$0xff] %v1587_v50 }
 0x56f   : > { %v1588_v60 = vsub.f32 %v3139_v38, %v1558_v16  ;;  %v1538_v21 = vpop.xlane.xlu1 %1537 }
 0x570   : > { %2293 = vlog2.f32 %v1538_v21  ;;  %v1532_v49 = vpop.xlane.xlu0 %1531 }
 0x571   : > { %1604 = vst [vmem:[%s3265_s9 + $0x8] sm:$0xff] %v1588_v60  ;;  %2295 = vlog2.f32 %v1532_v49 }
 0x573   : > { %v1534_v19 = vpop.xlane.xlu1 %1533 }
 0x574   : > { %2297 = vlog2.f32 %v1534_v19  ;;  %v1544_v11 = vpop.xlane.xlu0 %1543 }
 0x575   : > { %2299 = vlog2.f32 %v1544_v11 }
 0x577   : > { %v1546_v24 = vpop.xlane.xlu1 %1545 }
 0x578   : > { %2301 = vlog2.f32 %v1546_v24  ;;  %v1540_v63 = vpop.xlane.xlu0 %1539 }
 0x579   : > { %v2292_v0 = vpop.eup %2291  ;;  %2303 = vlog2.f32 %v1540_v63 }
 0x57a   : > { %v1568_v57 = vmul.f32 0.6931472, %v2292_v0 }
 0x57b   : > { %v1542_v28 = vpop.xlane.xlu1 %1541 }
 0x57c   : > { %v1593_v38 = vsub.f32 %v3142_v48, %v1568_v57  ;;  %2305 = vlog2.f32 %v1542_v28  ;;  %v1548_v32 = vpop.xlane.xlu0 %1547 }
 0x57d   : > { %v2294_v61 = vpop.eup %2293  ;;  %2307 = vlog2.f32 %v1548_v32 }
 0x57e   : > { %v2296_v62 = vpop.eup %2295  ;;  %1609 = vst [vmem:[%s3265_s9 + $0x30] sm:$0xff] %v1593_v38  ;;  %v1570_v14 = vmul.f32 0.6931472, %v2294_v61 }
 0x57f   : > { %v1564_v2 = vmul.f32 0.6931472, %v2296_v62  ;;  %v1550_v33 = vpop.xlane.xlu1 %1549 }
 0x580   : > { %v1594_v36 = vsub.f32 %v3145_v53, %v1570_v14  ;;  %2309 = vlog2.f32 %v1550_v33  ;;  %v1552_v17 = vpop.xlane.xlu0 %1551 }
 0x581   : > { %v2298_v9 = vpop.eup %2297  ;;  %v1591_v7 = vsub.f32 %v3147_v4, %v1564_v2  ;;  %2311 = vlog2.f32 %v1552_v17 }
 0x582   : > { %v2300_v48 = vpop.eup %2299  ;;  %1610 = vst [vmem:[%s3265_s9 + $0x38] sm:$0xff] %v1594_v36  ;;  %v1566_v20 = vmul.f32 0.6931472, %v2298_v9 }
 0x583   : > { %1607 = vst [vmem:[%s3265_s9 + $0x20] sm:$0xff] %v1591_v7  ;;  %v1576_v39 = vmul.f32 0.6931472, %v2300_v48  ;;  %v1554_v1 = vpop.xlane.xlu1 %1553 }
 0x584   : > { %v1592_v53 = vsub.f32 %v3151_v15, %v1566_v20  ;;  %2313 = vlog2.f32 %v1554_v1 }
 0x585   : > { %v2302_v22 = vpop.eup %2301  ;;  %v1597_v37 = vsub.f32 %v3153_v56, %v1576_v39 }
 0x586   : > { %v2304_v4 = vpop.eup %2303  ;;  %1608 = vst [vmem:[%s3265_s9 + $0x28] sm:$0xff] %v1592_v53  ;;  %v1578_v8 = vmul.f32 0.6931472, %v2302_v22 }
 0x587   : > { %1613 = vst [vmem:[%s3265_s9 + $0x50] sm:$0xff] %v1597_v37  ;;  %v1572_v44 = vmul.f32 0.6931472, %v2304_v4 }
 0x588   : > { %v1598_v23 = vsub.f32 %v3157_v52, %v1578_v8 }
 0x589   : > { %v2306_v47 = vpop.eup %2305  ;;  %v1595_v15 = vsub.f32 %v3159_v31, %v1572_v44 }
 0x58a   : > { %v2308_v5 = vpop.eup %2307  ;;  %1614 = vst [vmem:[%s3265_s9 + $0x58] sm:$0xff] %v1598_v23  ;;  %v1574_v56 = vmul.f32 0.6931472, %v2306_v47 }
 0x58b   : > { %1611 = vst [vmem:[%s3265_s9 + $0x40] sm:$0xff] %v1595_v15  ;;  %v1580_v3 = vmul.f32 0.6931472, %v2308_v5 }
 0x58c   : > { %v1596_v27 = vsub.f32 %v3164_v6, %v1574_v56 }
 0x58d   : > { %v2310_v59 = vpop.eup %2309  ;;  %v1599_v40 = vsub.f32 %v3167_v18, %v1580_v3 }
 0x58e   : > { %v2312_v52 = vpop.eup %2311  ;;  %1612 = vst [vmem:[%s3265_s9 + $0x48] sm:$0xff] %v1596_v27  ;;  %v1582_v31 = vmul.f32 0.6931472, %v2310_v59 }
 0x58f   : > { %1615 = vst [vmem:[%s3265_s9 + $0x60] sm:$0xff] %v1599_v40  ;;  %v1584_v51 = vmul.f32 0.6931472, %v2312_v52 }
 0x590   : > { %v1600_v29 = vsub.f32 %v3172_v12, %v1582_v31 }
 0x591   : > { %v2314_v54 = vpop.eup %2313  ;;  %v1601_v30 = vsub.f32 %v3175_v13, %v1584_v51 }
 0x592   : > { %1616 = vst [vmem:[%s3265_s9 + $0x68] sm:$0xff] %v1600_v29  ;;  %v1586_v6 = vmul.f32 0.6931472, %v2314_v54 }
 0x593   : > { %1617 = vst [vmem:[%s3265_s9 + $0x70] sm:$0xff] %v1601_v30 }
 0x594   : > { %v1602_v18 = vsub.f32 %v3180_v26, %v1586_v6 }
 0x596   : > { %1618 = vst [vmem:[%s3265_s9 + $0x78] sm:$0xff] %v1602_v18 }
 0x597 PF: > { %s24_s11 = sadd.s32 1, %s2535_s11   ;;  %s3270_s30 = smov %s2531_s10 }
 0x598   : > { %p21_p5 = scmp.ge.s32.totalorder %s24_s11, 5   ;;  %s3271_s10 = smov %s3273_s18 }
 0x59a   :  { %23 = sbr.rel (!%p21_p5) target bundleno = 5 (0x5), region = 131 }
 0x59f   :  { %1658 = vsyncpa [#allocation4], 1 }
 0x5a0   :  { %1660 = vsyncpa [#allocation4 + $0x1], 1 }
 0x5a1   :  { %1661 = vsyncpa [#allocation6], 1 }
 0x5a2   :  { %1662 = vsyncpa [#allocation9], 1 }
 0x5a3   :  { %1663 = vsyncpa [#allocation12], 1 }

</bundles_post_ra>
